<compile_context>
chip_gen: v7x
topology: tpu7x:2x2x1
jax: 0.10.0
libtpu: 0.0.40
codegen_flags: <defaults>
</compile_context>

<pallas_src>
import math
import functools
import jax
import jax.numpy as jnp
from jax.experimental import pallas as pl
from jax.experimental.pallas import tpu as pltpu

# ---------------- small synthetic config (DeepSeekConfig stand-in) ----------------
VOCAB      = 128          # lane-dense toy vocab
N_EMBD     = 128          # lane-dense hidden (one full vreg lane width)
N_HEADS    = 4
HEAD_DIM   = N_EMBD // N_HEADS
N_LAYERS   = 2
FFN_DIM    = 256
BLOCK_SIZE = 16
EPS        = 1e-6
ROPE_THETA = 10000.0


# ---------------------------------- helpers (host-side) ----------------------------------
def precompute_rope_maps(head_dim, n_heads, max_seq, theta=ROPE_THETA):
    """cos / sign-folded sin maps, (max_seq, n_heads*head_dim), interleaved (view_as_complex) convention.

    cos[pos, 2i] = cos[pos, 2i+1] = cos(theta_i * pos)
    sin[pos, 2i] = -sin(theta_i * pos),  sin[pos, 2i+1] = +sin(theta_i * pos)
    so that  out = x * cos + partner(x) * sin  with partner(x)[2i]=x[2i+1], partner(x)[2i+1]=x[2i].
    """
    inv_freq = 1.0 / (theta ** (jnp.arange(0, head_dim, 2, dtype=jnp.float32) / head_dim))
    t = jnp.arange(max_seq, dtype=jnp.float32)
    freqs = jnp.outer(t, inv_freq)                              # (max_seq, head_dim//2)
    cos = jnp.repeat(jnp.cos(freqs), 2, axis=1)                 # [c0, c0, c1, c1, ...]
    s = jnp.sin(freqs)
    sin = jnp.stack([-s, s], axis=-1).reshape(max_seq, head_dim)  # [-s0, +s0, -s1, +s1, ...]
    return jnp.tile(cos, (1, n_heads)), jnp.tile(sin, (1, n_heads))


def _rmsnorm(x, w):
    var = jnp.mean(x * x, axis=-1, keepdims=True)
    return x * jax.lax.rsqrt(var + EPS) * w


# ---------------------------------- fused layer-stack kernel ----------------------------------
def _stack_kernel(h0_ref, an_ref, fn_ref, nw_ref, wqkv_ref, wo_ref, w13_ref, w2_ref,
                  cos_ref, sin_ref, out_ref, h_vmem, *, batch, seq):
    l = pl.program_id(0)
    B, S = batch, seq
    D, F, H, HD = N_EMBD, FFN_DIM, N_HEADS, HEAD_DIM
    BS = B * S

    @pl.when(l == 0)
    def _init():
        h_vmem[...] = h0_ref[...]                       # load residual stream once

    h2d = h_vmem[...]                                   # (BS, D) f32 residual stream (VMEM-resident)
    cos = cos_ref[...]                                  # (BS, D)
    sin = sin_ref[...]                                  # (BS, D), pair sign folded in

    # ---------------- attention sub-block ----------------
    xn = _rmsnorm(h2d, an_ref[0]).astype(jnp.bfloat16)                    # (BS, D) bf16 MXU operand
    qkv = jnp.dot(xn, wqkv_ref[0], preferred_element_type=jnp.float32)    # (BS, 3D) f32

    even = (jax.lax.broadcasted_iota(jnp.int32, (BS, D), 1) % 2) == 0

    def rope(x):
        # interleaved-pair rotation via XLU lane rolls (no weight fold, no extra MXU flops)
        partner = jnp.where(even,
                            pltpu.roll(x, shift=D - 1, axis=1),    # even j pulls x[j+1]
                            pltpu.roll(x, shift=1, axis=1))        # odd  j pulls x[j-1]
        return x * cos + partner * sin

    q = rope(qkv[:, 0 * D:1 * D]).reshape(B, S, D)
    k = rope(qkv[:, 1 * D:2 * D]).reshape(B, S, D)
    v = qkv[:, 2 * D:3 * D].reshape(B, S, D)

    rows = jax.lax.broadcasted_iota(jnp.int32, (S, S), 0)
    cols = jax.lax.broadcasted_iota(jnp.int32, (S, S), 1)
    causal = (cols <= rows)[None]                       # (1, S, S), in-kernel causal mask
    scale = 1.0 / math.sqrt(HD)

    wo = wo_ref[0]                                      # (D, D) bf16
    attn_proj = jnp.zeros((BS, D), jnp.float32)
    # TODO(synk): flash-tile over kv blocks (online softmax) at real sequence lengths.
    for hh in range(H):                                 # static unroll over heads
        sl = slice(hh * HD, (hh + 1) * HD)
        qh = q[:, :, sl].astype(jnp.bfloat16)
        kh = k[:, :, sl].astype(jnp.bfloat16)
        vh = v[:, :, sl].astype(jnp.bfloat16)
        s = jnp.einsum('bqd,bkd->bqk', qh, kh,
                       preferred_element_type=jnp.float32) * scale        # (B, S, S)
        s = jnp.where(causal, s, -1e30)
        m = jnp.max(s, axis=-1, keepdims=True)
        p = jnp.exp(s - m)
        denom = jnp.sum(p, axis=-1, keepdims=True)
        p = p * pl.reciprocal(denom, approx=True)       # EUP reciprocal
        ctx = jnp.einsum('bqk,bkd->bqd', p.astype(jnp.bfloat16), vh,
                         preferred_element_type=jnp.float32)              # (B, S, HD)
        # accumulate straight through the per-head wo row-slice: no per-head concatenate
        attn_proj = attn_proj + jnp.dot(ctx.reshape(BS, HD).astype(jnp.bfloat16),
                                        wo[sl, :], preferred_element_type=jnp.float32)

    h2d = h2d + attn_proj                               # fused residual add

    # ---------------- FFN sub-block (fused w1|w3 + SwiGLU epilogue) ----------------
    xn = _rmsnorm(h2d, fn_ref[0]).astype(jnp.bfloat16)
    gu = jnp.dot(xn, w13_ref[0], preferred_element_type=jnp.float32)      # (BS, 2F) f32
    g = gu[:, :F]
    u = gu[:, F:]
    act = (g * jax.nn.sigmoid(g) * u).astype(jnp.bfloat16)
    h2d = h2d + jnp.dot(act, w2_ref[0], preferred_element_type=jnp.float32)

    h_vmem[...] = h2d                                   # carry residual stream to next layer

    @pl.when(l == pl.num_programs(0) - 1)
    def _write():
        # inference path only needs h[:, -1, :]; fuse the final RMSNorm here so the LM-head
        # kernel is a pure matmul and only (B, D) f32 ever hits HBM.
        last = h2d.reshape(B, S, D)[:, S - 1, :]        # (B, D)
        var = jnp.mean(last * last, axis=-1, keepdims=True)
        out_ref[...] = (last * jax.lax.rsqrt(var + EPS) * nw_ref[...]).astype(out_ref.dtype)


def run_layer_stack(h0, params):
    B, S, D = h0.shape
    L, F = N_LAYERS, FFN_DIM
    BS = B * S
    h0_2d = h0.reshape(BS, D)
    cos = jnp.tile(params["rope_cos"][:S], (B, 1))      # (BS, D)
    sin = jnp.tile(params["rope_sin"][:S], (B, 1))      # (BS, D)

    flops = L * (2 * BS * D * (3 * D + D + 3 * F) + 4 * B * S * S * D)
    transcendentals = L * (N_HEADS * B * S * S + BS * F)
    bytes_accessed = (BS * D * 4 + B * D * 4                               # h0 in + last-token out
                      + L * (3 * D * D + D * D + 2 * D * F + F * D) * 2    # bf16 weights, once each
                      + 2 * BS * D * 4 + L * 2 * D * 4 + D * 4)

    kernel = functools.partial(_stack_kernel, batch=B, seq=S)
    grid_spec = pltpu.PrefetchScalarGridSpec(
        num_scalar_prefetch=0,
        grid=(L,),                                       # weights streamed exactly once per layer
        in_specs=[
            pl.BlockSpec((BS, D), lambda l: (0, 0)),             # h0 (constant block -> fetched once)
            pl.BlockSpec((1, 1, D), lambda l: (l, 0, 0)),        # attn norm w
            pl.BlockSpec((1, 1, D), lambda l: (l, 0, 0)),        # ffn norm w
            pl.BlockSpec((1, D), lambda l: (0, 0)),              # final norm w
            pl.BlockSpec((1, D, 3 * D), lambda l: (l, 0, 0)),    # fused qkv (no RoPE fold)
            pl.BlockSpec((1, D, D), lambda l: (l, 0, 0)),        # wo
            pl.BlockSpec((1, D, 2 * F), lambda l: (l, 0, 0)),    # fused w1|w3
            pl.BlockSpec((1, F, D), lambda l: (l, 0, 0)),        # w2
            pl.BlockSpec((BS, D), lambda l: (0, 0)),             # rope cos map
            pl.BlockSpec((BS, D), lambda l: (0, 0)),             # rope sin map (sign-folded)
        ],
        out_specs=pl.BlockSpec((B, D), lambda l: (0, 0)),        # normalized last-token hidden
        scratch_shapes=[pltpu.VMEM((BS, D), jnp.float32)],
    )
    return pl.pallas_call(
        kernel,
        out_shape=jax.ShapeDtypeStruct((B, D), jnp.float32),
        grid_spec=grid_spec,
        compiler_params=pltpu.CompilerParams(
            dimension_semantics=("arbitrary",),
            vmem_limit_bytes=32 * 1024 * 1024),
        cost_estimate=pl.CostEstimate(flops=flops,
                                      transcendentals=transcendentals,
                                      bytes_accessed=bytes_accessed),
    )(h0_2d, params["attn_norm"], params["ffn_norm"], params["norm_w"],
      params["wqkv"], params["wo"], params["w13"], params["w2"], cos, sin)


# ---------------------------------- LM head (input already RMSNorm'd) ----------------------------------
def _head_kernel(x_ref, w_ref, o_ref):
    o_ref[...] = jnp.dot(x_ref[...].astype(jnp.bfloat16), w_ref[...],
                         preferred_element_type=jnp.float32).astype(o_ref.dtype)


def pallas_lm_head(x, head_w, tn=512):
    B, D = x.shape
    _, V = head_w.shape
    tn = min(tn, V)
    grid_spec = pltpu.PrefetchScalarGridSpec(
        num_scalar_prefetch=0,
        grid=(pl.cdiv(V, tn),),
        in_specs=[
            pl.BlockSpec((B, D), lambda j: (0, 0)),
            pl.BlockSpec((D, tn), lambda j: (0, j)),     # stream lane-dense vocab tiles of head_w
        ],
        out_specs=pl.BlockSpec((B, tn), lambda j: (0, j)),
    )
    return pl.pallas_call(
        _head_kernel,
        out_shape=jax.ShapeDtypeStruct((B, V), jnp.float32),
        grid_spec=grid_spec,
        compiler_params=pltpu.CompilerParams(dimension_semantics=("parallel",)),
    )(x, head_w)


# ---------------------------------- params + forward ----------------------------------
def init_params(key):
    std = 0.006
    keys = jax.random.split(key, 2 + N_LAYERS)
    params = {
        "embed": jax.random.normal(keys[0], (VOCAB, N_EMBD), jnp.float32) * std,
        "head_w": (jax.random.normal(keys[1], (N_EMBD, VOCAB), jnp.float32) * std).astype(jnp.bfloat16),
        "norm_w": jnp.ones((1, N_EMBD), jnp.float32),
        "attn_norm": jnp.ones((N_LAYERS, 1, N_EMBD), jnp.float32),
        "ffn_norm": jnp.ones((N_LAYERS, 1, N_EMBD), jnp.float32),
    }
    wqkv, wo, w13, w2 = [], [], [], []
    for l in range(N_LAYERS):
        lk = jax.random.split(keys[2 + l], 7)
        wq = jax.random.normal(lk[0], (N_EMBD, N_EMBD), jnp.float32) * std
        wk = jax.random.normal(lk[1], (N_EMBD, N_EMBD), jnp.float32) * std
        wv = jax.random.normal(lk[2], (N_EMBD, N_EMBD), jnp.float32) * std
        wo_l = jax.random.normal(lk[3], (N_EMBD, N_EMBD), jnp.float32) * std
        w1 = jax.random.normal(lk[4], (N_EMBD, FFN_DIM), jnp.float32) * std
        w3 = jax.random.normal(lk[5], (N_EMBD, FFN_DIM), jnp.float32) * std
        w2_l = jax.random.normal(lk[6], (FFN_DIM, N_EMBD), jnp.float32) * std
        wqkv.append(jnp.concatenate([wq, wk, wv], axis=1))     # (D, 3D) — RoPE applied in-kernel
        wo.append(wo_l)
        w13.append(jnp.concatenate([w1, w3], axis=1))
        w2.append(w2_l)
    params["wqkv"] = jnp.stack(wqkv).astype(jnp.bfloat16)      # (L, D, 3D)
    params["wo"]   = jnp.stack(wo).astype(jnp.bfloat16)        # (L, D, D)
    params["w13"]  = jnp.stack(w13).astype(jnp.bfloat16)       # (L, D, 2F)
    params["w2"]   = jnp.stack(w2).astype(jnp.bfloat16)        # (L, F, D)
    cos, sin = precompute_rope_maps(HEAD_DIM, N_HEADS, BLOCK_SIZE)
    params["rope_cos"] = cos
    params["rope_sin"] = sin
    return params


def deepseek_forward(params, input_ids):
    """Inference path of DeepSeekTransformer.forward (target_ids=None, mtp_depth=0)."""
    B, S = input_ids.shape
    h0 = jnp.take(params["embed"], input_ids, axis=0)            # embedding gather (plain-JAX glue)
    last_norm = run_layer_stack(h0, params)                      # (B, D): norm(h)[:, -1, :], fused
    logits = pallas_lm_head(last_norm, params["head_w"])         # (B, V)
    return logits[:, None, :]                                    # (B, 1, V)


if __name__ == "__main__":
    key = jax.random.PRNGKey(0)
    pkey, dkey = jax.random.split(key)
    params = init_params(pkey)

    B, S = 2, 8
    input_ids = jax.random.randint(dkey, (B, S), 0, VOCAB, dtype=jnp.int32)

    logits = deepseek_forward(params, input_ids)
    logits = jax.block_until_ready(logits)

    assert logits.shape == (B, 1, VOCAB), logits.shape
    assert bool(jnp.all(jnp.isfinite(logits)))
    print("KERNEL_OK")
</pallas_src>

<mosaic_0001>
module attributes {stable_mosaic.version = 11 : i64} {
  func.func @_stack_kernel(%arg0: i32, %arg1: memref<16x128xf32, #tpu.memory_space<vmem>>, %arg2: memref<1x1x128xf32, #tpu.memory_space<vmem>>, %arg3: memref<1x1x128xf32, #tpu.memory_space<vmem>>, %arg4: memref<1x128xf32, #tpu.memory_space<vmem>>, %arg5: memref<1x128x384xbf16, #tpu.memory_space<vmem>>, %arg6: memref<1x128x128xbf16, #tpu.memory_space<vmem>>, %arg7: memref<1x128x512xbf16, #tpu.memory_space<vmem>>, %arg8: memref<1x256x128xbf16, #tpu.memory_space<vmem>>, %arg9: memref<16x128xf32, #tpu.memory_space<vmem>>, %arg10: memref<16x128xf32, #tpu.memory_space<vmem>>, %arg11: memref<2x128xf32, #tpu.memory_space<vmem>>, %arg12: memref<16x128xf32, #tpu.memory_space<vmem>>) attributes {dimension_semantics = [#tpu.dimension_semantics<arbitrary>], iteration_bounds = array<i64: 2>, scalar_prefetch = 0 : i64, scratch_operands = 1 : i64, tpu.core_type = #tpu.core_type<tc>, window_params = [{pipeline_mode = #tpu.pipeline_mode<synchronous>, transform_indices = @transform_0, window_bounds = array<i64: 16, 128>}, {transform_indices = @transform_1, window_bounds = array<i64: 1, 1, 128>}, {transform_indices = @transform_2, window_bounds = array<i64: 1, 1, 128>}, {pipeline_mode = #tpu.pipeline_mode<synchronous>, transform_indices = @transform_3, window_bounds = array<i64: 1, 128>}, {transform_indices = @transform_4, window_bounds = array<i64: 1, 128, 384>}, {transform_indices = @transform_5, window_bounds = array<i64: 1, 128, 128>}, {transform_indices = @transform_6, window_bounds = array<i64: 1, 128, 512>}, {transform_indices = @transform_7, window_bounds = array<i64: 1, 256, 128>}, {pipeline_mode = #tpu.pipeline_mode<synchronous>, transform_indices = @transform_8, window_bounds = array<i64: 16, 128>}, {pipeline_mode = #tpu.pipeline_mode<synchronous>, transform_indices = @transform_9, window_bounds = array<i64: 16, 128>}, {pipeline_mode = #tpu.pipeline_mode<synchronous>, transform_indices = @transform_10, window_bounds = array<i64: 2, 128>}]} {
    %c0_i32 = arith.constant 0 : i32
    %0 = arith.cmpi eq, %arg0, %c0_i32 : i32
    %1 = arith.extui %0 : i1 to i32
    %c0_i32_0 = arith.constant 0 : i32
    %2 = arith.cmpi ne, %1, %c0_i32_0 : i32
    scf.if %2 {
      %c0_74 = arith.constant 0 : index
      %c0_75 = arith.constant 0 : index
      %225 = vector.load %arg1[%c0_74, %c0_75] : memref<16x128xf32, #tpu.memory_space<vmem>>, vector<16x128xf32>
      %c0_76 = arith.constant 0 : index
      %c0_77 = arith.constant 0 : index
      %226 = vector.load %arg12[%c0_76, %c0_77] : memref<16x128xf32, #tpu.memory_space<vmem>>, vector<16x128xf32>
      tpu.vector_store %arg12[%c0_76, %c0_77], %225 {strides = array<i32>} : memref<16x128xf32, #tpu.memory_space<vmem>>, vector<16x128xf32>,
    } else {
    }
    %c0 = arith.constant 0 : index
    %c0_1 = arith.constant 0 : index
    %3 = vector.load %arg12[%c0, %c0_1] : memref<16x128xf32, #tpu.memory_space<vmem>>, vector<16x128xf32>
    %c0_2 = arith.constant 0 : index
    %c0_3 = arith.constant 0 : index
    %4 = vector.load %arg9[%c0_2, %c0_3] : memref<16x128xf32, #tpu.memory_space<vmem>>, vector<16x128xf32>
    %c0_4 = arith.constant 0 : index
    %c0_5 = arith.constant 0 : index
    %5 = vector.load %arg10[%c0_4, %c0_5] : memref<16x128xf32, #tpu.memory_space<vmem>>, vector<16x128xf32>
    %c0_6 = arith.constant 0 : index
    %c0_7 = arith.constant 0 : index
    %c0_8 = arith.constant 0 : index
    %6 = vector.load %arg2[%c0_6, %c0_7, %c0_8] : memref<1x1x128xf32, #tpu.memory_space<vmem>>, vector<1x1x128xf32>
    %7 = vector.shape_cast %6 : vector<1x1x128xf32> to vector<1x128xf32>
    %8 = arith.mulf %3, %3 : vector<16x128xf32>
    %cst = arith.constant dense<0.000000e+00> : vector<16xf32>
    %9 = vector.multi_reduction <add>, %8, %cst [1] : vector<16x128xf32> to vector<16xf32>
    %10 = vector.shape_cast %9 : vector<16xf32> to vector<16x1xf32>
    %cst_9 = arith.constant 1.280000e+02 : f32
    %11 = vector.broadcast %cst_9 : f32 to vector<16x1xf32>
    %12 = arith.divf %10, %11 : vector<16x1xf32>
    %cst_10 = arith.constant 9.99999997E-7 : f32
    %13 = vector.broadcast %cst_10 : f32 to vector<16x1xf32>
    %14 = arith.addf %12, %13 : vector<16x1xf32>
    %15 = math.rsqrt %14 : vector<16x1xf32>
    %16 = vector.broadcast %15 : vector<16x1xf32> to vector<16x128xf32>
    %17 = arith.mulf %3, %16 : vector<16x128xf32>
    %18 = vector.broadcast %7 : vector<1x128xf32> to vector<16x128xf32>
    %19 = arith.mulf %17, %18 : vector<16x128xf32>
    %20 = arith.truncf %19 : vector<16x128xf32> to vector<16x128xbf16>
    %c0_11 = arith.constant 0 : index
    %c0_12 = arith.constant 0 : index
    %c0_13 = arith.constant 0 : index
    %21 = vector.load %arg5[%c0_11, %c0_12, %c0_13] : memref<1x128x384xbf16, #tpu.memory_space<vmem>>, vector<1x128x384xbf16>
    %22 = vector.shape_cast %21 : vector<1x128x384xbf16> to vector<128x384xbf16>
    %cst_14 = arith.constant dense<0.000000e+00> : vector<16x384xf32>
    %23 = tpu.matmul %20, %22, %cst_14 {dimension_numbers = #tpu.dot_dimension_numbers<[1], [0], [0], [1], [0, 0, 1, 1], [], []>} : vector<16x128xbf16>, vector<128x384xbf16>, vector<16x384xf32> -> vector<16x384xf32>
    %24 = tpu.iota {dimensions = array<i32: 1>} : vector<16x128xi32>
    %c2_i32 = arith.constant 2 : i32
    %c0_i32_15 = arith.constant 0 : i32
    %25 = arith.cmpi eq, %c2_i32, %c0_i32_15 : i32
    %c1_i32 = arith.constant 1 : i32
    %26 = arith.select %25, %c1_i32, %c2_i32 : i32
    %27 = vector.broadcast %26 : i32 to vector<16x128xi32>
    %28 = arith.remsi %24, %27 : vector<16x128xi32>
    %c0_i32_16 = arith.constant 0 : i32
    %29 = vector.broadcast %c0_i32_16 : i32 to vector<16x128xi32>
    %30 = arith.cmpi ne, %28, %29 : vector<16x128xi32>
    %c0_i32_17 = arith.constant 0 : i32
    %31 = vector.broadcast %c0_i32_17 : i32 to vector<16x128xi32>
    %32 = arith.cmpi slt, %28, %31 : vector<16x128xi32>
    %c0_i32_18 = arith.constant 0 : i32
    %33 = arith.cmpi slt, %26, %c0_i32_18 : i32
    %34 = vector.broadcast %33 : i1 to vector<16x128xi1>
    %35 = vector.broadcast %34 : vector<16x128xi1> to vector<16x128xi1>
    %36 = arith.xori %32, %35 : vector<16x128xi1>
    %37 = arith.andi %36, %30 : vector<16x128xi1>
    %38 = vector.broadcast %26 : i32 to vector<16x128xi32>
    %39 = arith.addi %28, %38 : vector<16x128xi32>
    %40 = arith.select %37, %39, %28 : vector<16x128xi1>, vector<16x128xi32>
    %c0_i32_19 = arith.constant 0 : i32
    %41 = vector.broadcast %c0_i32_19 : i32 to vector<16x128xi32>
    %42 = arith.cmpi eq, %40, %41 : vector<16x128xi32>
    %43 = vector.extract_strided_slice %23 {offsets = [0, 0], sizes = [16, 128], strides = [1, 1]} : vector<16x384xf32> to vector<16x128xf32>
    %c127_i32 = arith.constant 127 : i32
    %44 = tpu.dynamic_rotate %43 by %c127_i32 dim 1 : vector<16x128xf32>, i32 -> vector<16x128xf32>
    %c1_i32_20 = arith.constant 1 : i32
    %45 = tpu.dynamic_rotate %43 by %c1_i32_20 dim 1 : vector<16x128xf32>, i32 -> vector<16x128xf32>
    %46 = arith.select %42, %44, %45 : vector<16x128xi1>, vector<16x128xf32>
    %47 = arith.mulf %43, %4 : vector<16x128xf32>
    %48 = arith.mulf %46, %5 : vector<16x128xf32>
    %49 = arith.addf %47, %48 : vector<16x128xf32>
    %50 = vector.shape_cast %49 : vector<16x128xf32> to vector<2x8x128xf32>
    %51 = vector.extract_strided_slice %23 {offsets = [0, 128], sizes = [16, 128], strides = [1, 1]} : vector<16x384xf32> to vector<16x128xf32>
    %c127_i32_21 = arith.constant 127 : i32
    %52 = tpu.dynamic_rotate %51 by %c127_i32_21 dim 1 : vector<16x128xf32>, i32 -> vector<16x128xf32>
    %c1_i32_22 = arith.constant 1 : i32
    %53 = tpu.dynamic_rotate %51 by %c1_i32_22 dim 1 : vector<16x128xf32>, i32 -> vector<16x128xf32>
    %54 = arith.select %42, %52, %53 : vector<16x128xi1>, vector<16x128xf32>
    %55 = arith.mulf %51, %4 : vector<16x128xf32>
    %56 = arith.mulf %54, %5 : vector<16x128xf32>
    %57 = arith.addf %55, %56 : vector<16x128xf32>
    %58 = vector.shape_cast %57 : vector<16x128xf32> to vector<2x8x128xf32>
    %59 = vector.extract_strided_slice %23 {offsets = [0, 256], sizes = [16, 128], strides = [1, 1]} : vector<16x384xf32> to vector<16x128xf32>
    %60 = vector.shape_cast %59 : vector<16x128xf32> to vector<2x8x128xf32>
    %61 = tpu.iota {dimensions = array<i32: 0>} : vector<8x8xi32>
    %62 = tpu.iota {dimensions = array<i32: 1>} : vector<8x8xi32>
    %63 = arith.cmpi sle, %62, %61 : vector<8x8xi32>
    %64 = vector.shape_cast %63 : vector<8x8xi1> to vector<1x8x8xi1>
    %c0_23 = arith.constant 0 : index
    %c0_24 = arith.constant 0 : index
    %c0_25 = arith.constant 0 : index
    %65 = vector.load %arg6[%c0_23, %c0_24, %c0_25] : memref<1x128x128xbf16, #tpu.memory_space<vmem>>, vector<1x128x128xbf16>
    %66 = vector.shape_cast %65 : vector<1x128x128xbf16> to vector<128x128xbf16>
    %cst_26 = arith.constant 0.000000e+00 : f32
    %67 = vector.broadcast %cst_26 : f32 to vector<16x128xf32>
    %68 = vector.extract_strided_slice %50 {offsets = [0, 0, 0], sizes = [2, 8, 32], strides = [1, 1, 1]} : vector<2x8x128xf32> to vector<2x8x32xf32>
    %69 = arith.truncf %68 : vector<2x8x32xf32> to vector<2x8x32xbf16>
    %70 = vector.extract_strided_slice %58 {offsets = [0, 0, 0], sizes = [2, 8, 32], strides = [1, 1, 1]} : vector<2x8x128xf32> to vector<2x8x32xf32>
    %71 = arith.truncf %70 : vector<2x8x32xf32> to vector<2x8x32xbf16>
    %72 = vector.extract_strided_slice %60 {offsets = [0, 0, 0], sizes = [2, 8, 32], strides = [1, 1, 1]} : vector<2x8x128xf32> to vector<2x8x32xf32>
    %73 = arith.truncf %72 : vector<2x8x32xf32> to vector<2x8x32xbf16>
    "tpu.trace_start"() <{level = 10 : i32, message = "bqd,bkd->bqk"}> : () -> ()
    %cst_27 = arith.constant dense<0.000000e+00> : vector<2x8x8xf32>
    %74 = tpu.matmul %69, %71, %cst_27 {dimension_numbers = #tpu.dot_dimension_numbers<[2], [2], [1], [1], [0, 0, 0, 1, 1, 1], [0], [0]>} : vector<2x8x32xbf16>, vector<2x8x32xbf16>, vector<2x8x8xf32> -> vector<2x8x8xf32>
    "tpu.trace_stop"() : () -> ()
    %cst_28 = arith.constant 0.176776692 : f32
    %75 = vector.broadcast %cst_28 : f32 to vector<2x8x8xf32>
    %76 = arith.mulf %74, %75 : vector<2x8x8xf32>
    %cst_29 = arith.constant -1.000000e+30 : f32
    %77 = vector.shape_cast %64 : vector<1x8x8xi1> to vector<1x8x8xi1>
    %78 = vector.broadcast %77 : vector<1x8x8xi1> to vector<2x8x8xi1>
    %79 = vector.broadcast %cst_29 : f32 to vector<2x8x8xf32>
    %80 = arith.select %78, %76, %79 : vector<2x8x8xi1>, vector<2x8x8xf32>
    %cst_30 = arith.constant dense<0xFF800000> : vector<2x8xf32>
    %81 = vector.multi_reduction <maximumf>, %80, %cst_30 [2] : vector<2x8x8xf32> to vector<2x8xf32>
    %82 = vector.shape_cast %81 : vector<2x8xf32> to vector<2x8x1xf32>
    %83 = vector.broadcast %82 : vector<2x8x1xf32> to vector<2x8x8xf32>
    %84 = arith.subf %80, %83 : vector<2x8x8xf32>
    %85 = math.exp %84 : vector<2x8x8xf32>
    %cst_31 = arith.constant dense<0.000000e+00> : vector<2x8xf32>
    %86 = vector.multi_reduction <add>, %85, %cst_31 [2] : vector<2x8x8xf32> to vector<2x8xf32>
    %87 = vector.shape_cast %86 : vector<2x8xf32> to vector<2x8x1xf32>
    %88 = tpu.reciprocal %87 {approx = true} : vector<2x8x1xf32> -> vector<2x8x1xf32>
    %89 = vector.broadcast %88 : vector<2x8x1xf32> to vector<2x8x8xf32>
    %90 = arith.mulf %85, %89 : vector<2x8x8xf32>
    %91 = arith.truncf %90 : vector<2x8x8xf32> to vector<2x8x8xbf16>
    "tpu.trace_start"() <{level = 10 : i32, message = "bqk,bkd->bqd"}> : () -> ()
    %cst_32 = arith.constant dense<0.000000e+00> : vector<2x8x32xf32>
    %92 = tpu.matmul %91, %73, %cst_32 {dimension_numbers = #tpu.dot_dimension_numbers<[2], [1], [1], [2], [0, 0, 0, 1, 1, 2], [0], [0]>} : vector<2x8x8xbf16>, vector<2x8x32xbf16>, vector<2x8x32xf32> -> vector<2x8x32xf32>
    "tpu.trace_stop"() : () -> ()
    %93 = vector.shape_cast %92 : vector<2x8x32xf32> to vector<16x32xf32>
    %94 = arith.truncf %93 : vector<16x32xf32> to vector<16x32xbf16>
    %95 = vector.extract_strided_slice %66 {offsets = [0, 0], sizes = [32, 128], strides = [1, 1]} : vector<128x128xbf16> to vector<32x128xbf16>
    %cst_33 = arith.constant dense<0.000000e+00> : vector<16x128xf32>
    %96 = tpu.matmul %94, %95, %cst_33 {dimension_numbers = #tpu.dot_dimension_numbers<[1], [0], [0], [1], [0, 0, 1, 1], [], []>} : vector<16x32xbf16>, vector<32x128xbf16>, vector<16x128xf32> -> vector<16x128xf32>
    %97 = arith.addf %67, %96 : vector<16x128xf32>
    %98 = vector.extract_strided_slice %50 {offsets = [0, 0, 32], sizes = [2, 8, 32], strides = [1, 1, 1]} : vector<2x8x128xf32> to vector<2x8x32xf32>
    %99 = arith.truncf %98 : vector<2x8x32xf32> to vector<2x8x32xbf16>
    %100 = vector.extract_strided_slice %58 {offsets = [0, 0, 32], sizes = [2, 8, 32], strides = [1, 1, 1]} : vector<2x8x128xf32> to vector<2x8x32xf32>
    %101 = arith.truncf %100 : vector<2x8x32xf32> to vector<2x8x32xbf16>
    %102 = vector.extract_strided_slice %60 {offsets = [0, 0, 32], sizes = [2, 8, 32], strides = [1, 1, 1]} : vector<2x8x128xf32> to vector<2x8x32xf32>
    %103 = arith.truncf %102 : vector<2x8x32xf32> to vector<2x8x32xbf16>
    "tpu.trace_start"() <{level = 10 : i32, message = "bqd,bkd->bqk"}> : () -> ()
    %cst_34 = arith.constant dense<0.000000e+00> : vector<2x8x8xf32>
    %104 = tpu.matmul %99, %101, %cst_34 {dimension_numbers = #tpu.dot_dimension_numbers<[2], [2], [1], [1], [0, 0, 0, 1, 1, 1], [0], [0]>} : vector<2x8x32xbf16>, vector<2x8x32xbf16>, vector<2x8x8xf32> -> vector<2x8x8xf32>
    "tpu.trace_stop"() : () -> ()
    %cst_35 = arith.constant 0.176776692 : f32
    %105 = vector.broadcast %cst_35 : f32 to vector<2x8x8xf32>
    %106 = arith.mulf %104, %105 : vector<2x8x8xf32>
    %cst_36 = arith.constant -1.000000e+30 : f32
    %107 = vector.shape_cast %64 : vector<1x8x8xi1> to vector<1x8x8xi1>
    %108 = vector.broadcast %107 : vector<1x8x8xi1> to vector<2x8x8xi1>
    %109 = vector.broadcast %cst_36 : f32 to vector<2x8x8xf32>
    %110 = arith.select %108, %106, %109 : vector<2x8x8xi1>, vector<2x8x8xf32>
    %cst_37 = arith.constant dense<0xFF800000> : vector<2x8xf32>
    %111 = vector.multi_reduction <maximumf>, %110, %cst_37 [2] : vector<2x8x8xf32> to vector<2x8xf32>
    %112 = vector.shape_cast %111 : vector<2x8xf32> to vector<2x8x1xf32>
    %113 = vector.broadcast %112 : vector<2x8x1xf32> to vector<2x8x8xf32>
    %114 = arith.subf %110, %113 : vector<2x8x8xf32>
    %115 = math.exp %114 : vector<2x8x8xf32>
    %cst_38 = arith.constant dense<0.000000e+00> : vector<2x8xf32>
    %116 = vector.multi_reduction <add>, %115, %cst_38 [2] : vector<2x8x8xf32> to vector<2x8xf32>
    %117 = vector.shape_cast %116 : vector<2x8xf32> to vector<2x8x1xf32>
    %118 = tpu.reciprocal %117 {approx = true} : vector<2x8x1xf32> -> vector<2x8x1xf32>
    %119 = vector.broadcast %118 : vector<2x8x1xf32> to vector<2x8x8xf32>
    %120 = arith.mulf %115, %119 : vector<2x8x8xf32>
    %121 = arith.truncf %120 : vector<2x8x8xf32> to vector<2x8x8xbf16>
    "tpu.trace_start"() <{level = 10 : i32, message = "bqk,bkd->bqd"}> : () -> ()
    %cst_39 = arith.constant dense<0.000000e+00> : vector<2x8x32xf32>
    %122 = tpu.matmul %121, %103, %cst_39 {dimension_numbers = #tpu.dot_dimension_numbers<[2], [1], [1], [2], [0, 0, 0, 1, 1, 2], [0], [0]>} : vector<2x8x8xbf16>, vector<2x8x32xbf16>, vector<2x8x32xf32> -> vector<2x8x32xf32>
    "tpu.trace_stop"() : () -> ()
    %123 = vector.shape_cast %122 : vector<2x8x32xf32> to vector<16x32xf32>
    %124 = arith.truncf %123 : vector<16x32xf32> to vector<16x32xbf16>
    %125 = vector.extract_strided_slice %66 {offsets = [32, 0], sizes = [32, 128], strides = [1, 1]} : vector<128x128xbf16> to vector<32x128xbf16>
    %cst_40 = arith.constant dense<0.000000e+00> : vector<16x128xf32>
    %126 = tpu.matmul %124, %125, %cst_40 {dimension_numbers = #tpu.dot_dimension_numbers<[1], [0], [0], [1], [0, 0, 1, 1], [], []>} : vector<16x32xbf16>, vector<32x128xbf16>, vector<16x128xf32> -> vector<16x128xf32>
    %127 = arith.addf %97, %126 : vector<16x128xf32>
    %128 = vector.extract_strided_slice %50 {offsets = [0, 0, 64], sizes = [2, 8, 32], strides = [1, 1, 1]} : vector<2x8x128xf32> to vector<2x8x32xf32>
    %129 = arith.truncf %128 : vector<2x8x32xf32> to vector<2x8x32xbf16>
    %130 = vector.extract_strided_slice %58 {offsets = [0, 0, 64], sizes = [2, 8, 32], strides = [1, 1, 1]} : vector<2x8x128xf32> to vector<2x8x32xf32>
    %131 = arith.truncf %130 : vector<2x8x32xf32> to vector<2x8x32xbf16>
    %132 = vector.extract_strided_slice %60 {offsets = [0, 0, 64], sizes = [2, 8, 32], strides = [1, 1, 1]} : vector<2x8x128xf32> to vector<2x8x32xf32>
    %133 = arith.truncf %132 : vector<2x8x32xf32> to vector<2x8x32xbf16>
    "tpu.trace_start"() <{level = 10 : i32, message = "bqd,bkd->bqk"}> : () -> ()
    %cst_41 = arith.constant dense<0.000000e+00> : vector<2x8x8xf32>
    %134 = tpu.matmul %129, %131, %cst_41 {dimension_numbers = #tpu.dot_dimension_numbers<[2], [2], [1], [1], [0, 0, 0, 1, 1, 1], [0], [0]>} : vector<2x8x32xbf16>, vector<2x8x32xbf16>, vector<2x8x8xf32> -> vector<2x8x8xf32>
    "tpu.trace_stop"() : () -> ()
    %cst_42 = arith.constant 0.176776692 : f32
    %135 = vector.broadcast %cst_42 : f32 to vector<2x8x8xf32>
    %136 = arith.mulf %134, %135 : vector<2x8x8xf32>
    %cst_43 = arith.constant -1.000000e+30 : f32
    %137 = vector.shape_cast %64 : vector<1x8x8xi1> to vector<1x8x8xi1>
    %138 = vector.broadcast %137 : vector<1x8x8xi1> to vector<2x8x8xi1>
    %139 = vector.broadcast %cst_43 : f32 to vector<2x8x8xf32>
    %140 = arith.select %138, %136, %139 : vector<2x8x8xi1>, vector<2x8x8xf32>
    %cst_44 = arith.constant dense<0xFF800000> : vector<2x8xf32>
    %141 = vector.multi_reduction <maximumf>, %140, %cst_44 [2] : vector<2x8x8xf32> to vector<2x8xf32>
    %142 = vector.shape_cast %141 : vector<2x8xf32> to vector<2x8x1xf32>
    %143 = vector.broadcast %142 : vector<2x8x1xf32> to vector<2x8x8xf32>
    %144 = arith.subf %140, %143 : vector<2x8x8xf32>
    %145 = math.exp %144 : vector<2x8x8xf32>
    %cst_45 = arith.constant dense<0.000000e+00> : vector<2x8xf32>
    %146 = vector.multi_reduction <add>, %145, %cst_45 [2] : vector<2x8x8xf32> to vector<2x8xf32>
    %147 = vector.shape_cast %146 : vector<2x8xf32> to vector<2x8x1xf32>
    %148 = tpu.reciprocal %147 {approx = true} : vector<2x8x1xf32> -> vector<2x8x1xf32>
    %149 = vector.broadcast %148 : vector<2x8x1xf32> to vector<2x8x8xf32>
    %150 = arith.mulf %145, %149 : vector<2x8x8xf32>
    %151 = arith.truncf %150 : vector<2x8x8xf32> to vector<2x8x8xbf16>
    "tpu.trace_start"() <{level = 10 : i32, message = "bqk,bkd->bqd"}> : () -> ()
    %cst_46 = arith.constant dense<0.000000e+00> : vector<2x8x32xf32>
    %152 = tpu.matmul %151, %133, %cst_46 {dimension_numbers = #tpu.dot_dimension_numbers<[2], [1], [1], [2], [0, 0, 0, 1, 1, 2], [0], [0]>} : vector<2x8x8xbf16>, vector<2x8x32xbf16>, vector<2x8x32xf32> -> vector<2x8x32xf32>
    "tpu.trace_stop"() : () -> ()
    %153 = vector.shape_cast %152 : vector<2x8x32xf32> to vector<16x32xf32>
    %154 = arith.truncf %153 : vector<16x32xf32> to vector<16x32xbf16>
    %155 = vector.extract_strided_slice %66 {offsets = [64, 0], sizes = [32, 128], strides = [1, 1]} : vector<128x128xbf16> to vector<32x128xbf16>
    %cst_47 = arith.constant dense<0.000000e+00> : vector<16x128xf32>
    %156 = tpu.matmul %154, %155, %cst_47 {dimension_numbers = #tpu.dot_dimension_numbers<[1], [0], [0], [1], [0, 0, 1, 1], [], []>} : vector<16x32xbf16>, vector<32x128xbf16>, vector<16x128xf32> -> vector<16x128xf32>
    %157 = arith.addf %127, %156 : vector<16x128xf32>
    %158 = vector.extract_strided_slice %50 {offsets = [0, 0, 96], sizes = [2, 8, 32], strides = [1, 1, 1]} : vector<2x8x128xf32> to vector<2x8x32xf32>
    %159 = arith.truncf %158 : vector<2x8x32xf32> to vector<2x8x32xbf16>
    %160 = vector.extract_strided_slice %58 {offsets = [0, 0, 96], sizes = [2, 8, 32], strides = [1, 1, 1]} : vector<2x8x128xf32> to vector<2x8x32xf32>
    %161 = arith.truncf %160 : vector<2x8x32xf32> to vector<2x8x32xbf16>
    %162 = vector.extract_strided_slice %60 {offsets = [0, 0, 96], sizes = [2, 8, 32], strides = [1, 1, 1]} : vector<2x8x128xf32> to vector<2x8x32xf32>
    %163 = arith.truncf %162 : vector<2x8x32xf32> to vector<2x8x32xbf16>
    "tpu.trace_start"() <{level = 10 : i32, message = "bqd,bkd->bqk"}> : () -> ()
    %cst_48 = arith.constant dense<0.000000e+00> : vector<2x8x8xf32>
    %164 = tpu.matmul %159, %161, %cst_48 {dimension_numbers = #tpu.dot_dimension_numbers<[2], [2], [1], [1], [0, 0, 0, 1, 1, 1], [0], [0]>} : vector<2x8x32xbf16>, vector<2x8x32xbf16>, vector<2x8x8xf32> -> vector<2x8x8xf32>
    "tpu.trace_stop"() : () -> ()
    %cst_49 = arith.constant 0.176776692 : f32
    %165 = vector.broadcast %cst_49 : f32 to vector<2x8x8xf32>
    %166 = arith.mulf %164, %165 : vector<2x8x8xf32>
    %cst_50 = arith.constant -1.000000e+30 : f32
    %167 = vector.shape_cast %64 : vector<1x8x8xi1> to vector<1x8x8xi1>
    %168 = vector.broadcast %167 : vector<1x8x8xi1> to vector<2x8x8xi1>
    %169 = vector.broadcast %cst_50 : f32 to vector<2x8x8xf32>
    %170 = arith.select %168, %166, %169 : vector<2x8x8xi1>, vector<2x8x8xf32>
    %cst_51 = arith.constant dense<0xFF800000> : vector<2x8xf32>
    %171 = vector.multi_reduction <maximumf>, %170, %cst_51 [2] : vector<2x8x8xf32> to vector<2x8xf32>
    %172 = vector.shape_cast %171 : vector<2x8xf32> to vector<2x8x1xf32>
    %173 = vector.broadcast %172 : vector<2x8x1xf32> to vector<2x8x8xf32>
    %174 = arith.subf %170, %173 : vector<2x8x8xf32>
    %175 = math.exp %174 : vector<2x8x8xf32>
    %cst_52 = arith.constant dense<0.000000e+00> : vector<2x8xf32>
    %176 = vector.multi_reduction <add>, %175, %cst_52 [2] : vector<2x8x8xf32> to vector<2x8xf32>
    %177 = vector.shape_cast %176 : vector<2x8xf32> to vector<2x8x1xf32>
    %178 = tpu.reciprocal %177 {approx = true} : vector<2x8x1xf32> -> vector<2x8x1xf32>
    %179 = vector.broadcast %178 : vector<2x8x1xf32> to vector<2x8x8xf32>
    %180 = arith.mulf %175, %179 : vector<2x8x8xf32>
    %181 = arith.truncf %180 : vector<2x8x8xf32> to vector<2x8x8xbf16>
    "tpu.trace_start"() <{level = 10 : i32, message = "bqk,bkd->bqd"}> : () -> ()
    %cst_53 = arith.constant dense<0.000000e+00> : vector<2x8x32xf32>
    %182 = tpu.matmul %181, %163, %cst_53 {dimension_numbers = #tpu.dot_dimension_numbers<[2], [1], [1], [2], [0, 0, 0, 1, 1, 2], [0], [0]>} : vector<2x8x8xbf16>, vector<2x8x32xbf16>, vector<2x8x32xf32> -> vector<2x8x32xf32>
    "tpu.trace_stop"() : () -> ()
    %183 = vector.shape_cast %182 : vector<2x8x32xf32> to vector<16x32xf32>
    %184 = arith.truncf %183 : vector<16x32xf32> to vector<16x32xbf16>
    %185 = vector.extract_strided_slice %66 {offsets = [96, 0], sizes = [32, 128], strides = [1, 1]} : vector<128x128xbf16> to vector<32x128xbf16>
    %cst_54 = arith.constant dense<0.000000e+00> : vector<16x128xf32>
    %186 = tpu.matmul %184, %185, %cst_54 {dimension_numbers = #tpu.dot_dimension_numbers<[1], [0], [0], [1], [0, 0, 1, 1], [], []>} : vector<16x32xbf16>, vector<32x128xbf16>, vector<16x128xf32> -> vector<16x128xf32>
    %187 = arith.addf %157, %186 : vector<16x128xf32>
    %188 = arith.addf %3, %187 : vector<16x128xf32>
    %c0_55 = arith.constant 0 : index
    %c0_56 = arith.constant 0 : index
    %c0_57 = arith.constant 0 : index
    %189 = vector.load %arg3[%c0_55, %c0_56, %c0_57] : memref<1x1x128xf32, #tpu.memory_space<vmem>>, vector<1x1x128xf32>
    %190 = vector.shape_cast %189 : vector<1x1x128xf32> to vector<1x128xf32>
    %191 = arith.mulf %188, %188 : vector<16x128xf32>
    %cst_58 = arith.constant dense<0.000000e+00> : vector<16xf32>
    %192 = vector.multi_reduction <add>, %191, %cst_58 [1] : vector<16x128xf32> to vector<16xf32>
    %193 = vector.shape_cast %192 : vector<16xf32> to vector<16x1xf32>
    %cst_59 = arith.constant 1.280000e+02 : f32
    %194 = vector.broadcast %cst_59 : f32 to vector<16x1xf32>
    %195 = arith.divf %193, %194 : vector<16x1xf32>
    %cst_60 = arith.constant 9.99999997E-7 : f32
    %196 = vector.broadcast %cst_60 : f32 to vector<16x1xf32>
    %197 = arith.addf %195, %196 : vector<16x1xf32>
    %198 = math.rsqrt %197 : vector<16x1xf32>
    %199 = vector.broadcast %198 : vector<16x1xf32> to vector<16x128xf32>
    %200 = arith.mulf %188, %199 : vector<16x128xf32>
    %201 = vector.broadcast %190 : vector<1x128xf32> to vector<16x128xf32>
    %202 = arith.mulf %200, %201 : vector<16x128xf32>
    %203 = arith.truncf %202 : vector<16x128xf32> to vector<16x128xbf16>
    %c0_61 = arith.constant 0 : index
    %c0_62 = arith.constant 0 : index
    %c0_63 = arith.constant 0 : index
    %204 = vector.load %arg7[%c0_61, %c0_62, %c0_63] : memref<1x128x512xbf16, #tpu.memory_space<vmem>>, vector<1x128x512xbf16>
    %205 = vector.shape_cast %204 : vector<1x128x512xbf16> to vector<128x512xbf16>
    %cst_64 = arith.constant dense<0.000000e+00> : vector<16x512xf32>
    %206 = tpu.matmul %203, %205, %cst_64 {dimension_numbers = #tpu.dot_dimension_numbers<[1], [0], [0], [1], [0, 0, 1, 1], [], []>} : vector<16x128xbf16>, vector<128x512xbf16>, vector<16x512xf32> -> vector<16x512xf32>
    %207 = vector.extract_strided_slice %206 {offsets = [0, 0], sizes = [16, 256], strides = [1, 1]} : vector<16x512xf32> to vector<16x256xf32>
    %208 = vector.extract_strided_slice %206 {offsets = [0, 256], sizes = [16, 256], strides = [1, 1]} : vector<16x512xf32> to vector<16x256xf32>
    %209 = arith.negf %207 : vector<16x256xf32>
    %210 = math.exp %209 : vector<16x256xf32>
    %cst_65 = arith.constant 1.000000e+00 : f32
    %211 = vector.broadcast %cst_65 : f32 to vector<16x256xf32>
    %212 = arith.addf %211, %210 : vector<16x256xf32>
    %213 = arith.divf %211, %212 : vector<16x256xf32>
    %214 = arith.mulf %207, %213 : vector<16x256xf32>
    %215 = arith.mulf %214, %208 : vector<16x256xf32>
    %216 = arith.truncf %215 : vector<16x256xf32> to vector<16x256xbf16>
    %c0_66 = arith.constant 0 : index
    %c0_67 = arith.constant 0 : index
    %c0_68 = arith.constant 0 : index
    %217 = vector.load %arg8[%c0_66, %c0_67, %c0_68] : memref<1x256x128xbf16, #tpu.memory_space<vmem>>, vector<1x256x128xbf16>
    %218 = vector.shape_cast %217 : vector<1x256x128xbf16> to vector<256x128xbf16>
    %cst_69 = arith.constant dense<0.000000e+00> : vector<16x128xf32>
    %219 = tpu.matmul %216, %218, %cst_69 {dimension_numbers = #tpu.dot_dimension_numbers<[1], [0], [0], [1], [0, 0, 1, 1], [], []>} : vector<16x256xbf16>, vector<256x128xbf16>, vector<16x128xf32> -> vector<16x128xf32>
    %220 = arith.addf %188, %219 : vector<16x128xf32>
    %c0_70 = arith.constant 0 : index
    %c0_71 = arith.constant 0 : index
    %221 = vector.load %arg12[%c0_70, %c0_71] : memref<16x128xf32, #tpu.memory_space<vmem>>, vector<16x128xf32>
    tpu.vector_store %arg12[%c0_70, %c0_71], %220 {strides = array<i32>} : memref<16x128xf32, #tpu.memory_space<vmem>>, vector<16x128xf32>,
    %c1_i32_72 = arith.constant 1 : i32
    %222 = arith.cmpi eq, %arg0, %c1_i32_72 : i32
    %223 = arith.extui %222 : i1 to i32
    %c0_i32_73 = arith.constant 0 : i32
    %224 = arith.cmpi ne, %223, %c0_i32_73 : i32
    scf.if %224 {
      %225 = vector.shape_cast %220 : vector<16x128xf32> to vector<2x8x128xf32>
      %226 = vector.extract_strided_slice %225 {offsets = [0, 7, 0], sizes = [2, 1, 128], strides = [1, 1, 1]} : vector<2x8x128xf32> to vector<2x1x128xf32>
      %227 = vector.shape_cast %226 : vector<2x1x128xf32> to vector<2x128xf32>
      %228 = arith.mulf %227, %227 : vector<2x128xf32>
      %cst_74 = arith.constant dense<0.000000e+00> : vector<2xf32>
      %229 = vector.multi_reduction <add>, %228, %cst_74 [1] : vector<2x128xf32> to vector<2xf32>
      %230 = vector.shape_cast %229 : vector<2xf32> to vector<2x1xf32>
      %cst_75 = arith.constant 1.280000e+02 : f32
      %231 = vector.broadcast %cst_75 : f32 to vector<2x1xf32>
      %232 = arith.divf %230, %231 : vector<2x1xf32>
      %cst_76 = arith.constant 9.99999997E-7 : f32
      %233 = vector.broadcast %cst_76 : f32 to vector<2x1xf32>
      %234 = arith.addf %232, %233 : vector<2x1xf32>
      %235 = math.rsqrt %234 : vector<2x1xf32>
      %236 = vector.broadcast %235 : vector<2x1xf32> to vector<2x128xf32>
      %237 = arith.mulf %227, %236 : vector<2x128xf32>
      %c0_77 = arith.constant 0 : index
      %c0_78 = arith.constant 0 : index
      %238 = vector.load %arg4[%c0_77, %c0_78] : memref<1x128xf32, #tpu.memory_space<vmem>>, vector<1x128xf32>
      %239 = vector.broadcast %238 : vector<1x128xf32> to vector<2x128xf32>
      %240 = arith.mulf %237, %239 : vector<2x128xf32>
      %c0_79 = arith.constant 0 : index
      %c0_80 = arith.constant 0 : index
      %241 = vector.load %arg11[%c0_79, %c0_80] : memref<2x128xf32, #tpu.memory_space<vmem>>, vector<2x128xf32>
      tpu.vector_store %arg11[%c0_79, %c0_80], %240 {strides = array<i32>} : memref<2x128xf32, #tpu.memory_space<vmem>>, vector<2x128xf32>,
    } else {
    }
    return
  }
  func.func @transform_0(%arg0: i32) -> (i32, i32) {
    %c0_i32 = arith.constant 0 : i32
    %c0_i32_0 = arith.constant 0 : i32
    %c0_i32_1 = arith.constant 0 : i32
    return %c0_i32, %c0_i32_0 : i32, i32
  }
  func.func @transform_1(%arg0: i32) -> (i32, i32, i32) {
    %c0_i32 = arith.constant 0 : i32
    %c0_i32_0 = arith.constant 0 : i32
    %c0_i32_1 = arith.constant 0 : i32
    return %arg0, %c0_i32, %c0_i32_0 : i32, i32, i32
  }
  func.func @transform_2(%arg0: i32) -> (i32, i32, i32) {
    %c0_i32 = arith.constant 0 : i32
    %c0_i32_0 = arith.constant 0 : i32
    %c0_i32_1 = arith.constant 0 : i32
    return %arg0, %c0_i32, %c0_i32_0 : i32, i32, i32
  }
  func.func @transform_3(%arg0: i32) -> (i32, i32) {
    %c0_i32 = arith.constant 0 : i32
    %c0_i32_0 = arith.constant 0 : i32
    %c0_i32_1 = arith.constant 0 : i32
    return %c0_i32, %c0_i32_0 : i32, i32
  }
  func.func @transform_4(%arg0: i32) -> (i32, i32, i32) {
    %c0_i32 = arith.constant 0 : i32
    %c0_i32_0 = arith.constant 0 : i32
    %c0_i32_1 = arith.constant 0 : i32
    return %arg0, %c0_i32, %c0_i32_0 : i32, i32, i32
  }
  func.func @transform_5(%arg0: i32) -> (i32, i32, i32) {
    %c0_i32 = arith.constant 0 : i32
    %c0_i32_0 = arith.constant 0 : i32
    %c0_i32_1 = arith.constant 0 : i32
    return %arg0, %c0_i32, %c0_i32_0 : i32, i32, i32
  }
  func.func @transform_6(%arg0: i32) -> (i32, i32, i32) {
    %c0_i32 = arith.constant 0 : i32
    %c0_i32_0 = arith.constant 0 : i32
    %c0_i32_1 = arith.constant 0 : i32
    return %arg0, %c0_i32, %c0_i32_0 : i32, i32, i32
  }
  func.func @transform_7(%arg0: i32) -> (i32, i32, i32) {
    %c0_i32 = arith.constant 0 : i32
    %c0_i32_0 = arith.constant 0 : i32
    %c0_i32_1 = arith.constant 0 : i32
    return %arg0, %c0_i32, %c0_i32_0 : i32, i32, i32
  }
  func.func @transform_8(%arg0: i32) -> (i32, i32) {
    %c0_i32 = arith.constant 0 : i32
    %c0_i32_0 = arith.constant 0 : i32
    %c0_i32_1 = arith.constant 0 : i32
    return %c0_i32, %c0_i32_0 : i32, i32
  }
  func.func @transform_9(%arg0: i32) -> (i32, i32) {
    %c0_i32 = arith.constant 0 : i32
    %c0_i32_0 = arith.constant 0 : i32
    %c0_i32_1 = arith.constant 0 : i32
    return %c0_i32, %c0_i32_0 : i32, i32
  }
  func.func @transform_10(%arg0: i32) -> (i32, i32) {
    %c0_i32 = arith.constant 0 : i32
    %c0_i32_0 = arith.constant 0 : i32
    %c0_i32_1 = arith.constant 0 : i32
    return %c0_i32, %c0_i32_0 : i32, i32
  }
}

</mosaic_0001>

<bundles_post_ra>
// kernel: tpu_custom_call.1
= control target key start
LH: loop header
LB: loop body
LE: loop exit
PB: predicated region body
PF: predicated region fallthrough
CT: control target
= control target key end

     0   :  { %s4493_s0 = inlined_call_operand.hbm [shape: f32[16,128], index: 0, kind: input, shape index: {}]   ;;  %s4494_s1 = inlined_call_operand.vmem [shape: f32[2,1,128], index: 1, kind: input, shape index: {}]   ;;  %s4495_s2 = inlined_call_operand.hbm [shape: f32[2,1,128], index: 2, kind: input, shape index: {}]   ;;  %s4496_s3 = inlined_call_operand.hbm [shape: f32[1,128], index: 3, kind: input, shape index: {}]   ;;  %s4497_s4 = inlined_call_operand.hbm [shape: bf16[2,128,384], index: 4, kind: input, shape index: {}]   ;;  %s4498_s5 = inlined_call_operand.hbm [shape: bf16[2,128,128], index: 5, kind: input, shape index: {}]   ;;  %s4499_s6 = inlined_call_operand.hbm [shape: bf16[2,128,512], index: 6, kind: input, shape index: {}]   ;;  %s4500_s7 = inlined_call_operand.hbm [shape: bf16[2,256,128], index: 7, kind: input, shape index: {}]   ;;  %s4501_s8 = inlined_call_operand.vmem [shape: f32[16,128], index: 8, kind: input, shape index: {}]   ;;  %s4502_s9 = inlined_call_operand.vmem [shape: f32[16,128], index: 9, kind: input, shape index: {}]   ;;  %s4503_s10 = inlined_call_operand.hbm [shape: f32[2,128], index: 10, kind: output, shape index: {}]  }
   0x1   :  { %4520 = sst [smem:[#allocation25_spill]] %s4496_s3 }
   0x2   :  { %4521 = sst [smem:[#allocation26_spill]] %s4497_s4 }
   0x3   :  { %4522 = sst [smem:[#allocation27_spill]] %s4502_s9 }
   0x4   :  { %4523 = sst [smem:[#allocation28_spill]] %s4503_s10 }
   0x5   :  { %15 = vsyncpa [#allocation4], 0 }
   0x6   :  { %16 = vsyncpa [#allocation7], 0 }
   0x7   :  { %18 = vsyncpa [#allocation7 + $0x1], 0 }
   0x8   :  { %19 = vsyncpa [#allocation10], 0 }
   0x9   :  { %21 = vsyncpa [#allocation10 + $0x1], 0 }
   0xa   :  { %22 = vsyncpa [#allocation13], 0 }
   0xb   :  { %24 = vsyncpa [#allocation13 + $0x1], 0 }
   0xc   :  { %25 = vsyncpa [#allocation5], 0  ;;  %s3767_s13 = smov 0   ;;  %s3769_s14 = smov 0  }
   0xd   :  { %s3771_s15 = smov 0   ;;  %s3773_s16 = smov 0  }
   0xe LB: > { %4524 = sst [smem:[#allocation22_spill]] %s3682_s15  ;;  %s3786_s17 = sadd.s32 4294967295, %s3686_s16   ;;  %s3686_s16 = sphi %s3773_s16, %s4556_s16   ;;  %s3682_s15 = sphi %s3771_s15, %s4558_s15   ;;  %s3678_s14 = sphi %s3769_s14, %s4560_s14   ;;  %s3674_s13 = sphi %s3767_s13, %s4559_s13  }
   0xf   : > { %s3789_s18 = sadd.s32 1, %s3686_s16   ;;  %s85_s20 = sadd.s32 1, %s3682_s15 }
  0x10   : > { %4525 = sst [smem:[#allocation23_spill]] %s3789_s18  ;;  %s82_s19 = ssub.s32 %s3686_s16, %s3789_s18 }
  0x11   : > { %p83_p0 = scmp.eq.s32.totalorder %s82_s19, 0  ;;  %p92_p1 = scmp.ne.s32.totalorder %s3682_s15, %s3678_s14 }
  0x12   : > { %p93_p2 = scmp.eq.s32.totalorder %s3686_s16, 0  ;;  %p98_p3 = scmp.ne.s32.totalorder %s3678_s14, %s3674_s13 }
  0x13   : > { %s3799_s21 = scalar_select %p83_p0, %s3682_s15, %s85_s20  }
  0x14   : > { %p3801_p4 = por %p93_p2, %p92_p1  ;;  %p4505_p5 = scmp.eq.s32.totalorder %s3786_s17, 0 }
  0x15   : > { %4526 = sst [smem:[#allocation24_spill]] %s3799_s21  ;;  %p2768_p6 = scmp.ge.s32.totalorder %s3686_s16, 1 }
  0x16   : > { %p297_p7 = scmp.lt.s32.totalorder %s3686_s16, 3  ;;  %p3810_p8 = por %p4505_p5, %p98_p3 }
  0x17   : > { %s3688_s25 = smov [#allocation8]   ;;  %p3178_p12 = scmp.lt.s32.totalorder %s3686_s16, 2 }
  0x18   : > { %s4528_s23 = scalar_select %p3810_p8, 1, 0 }
  0x19   : > { %p3815_p10 = pnand %p2768_p6, %p297_p7  ;;  %s323_s26 = sshll.u32 %s3688_s25, 4  ;;  %s324_s26 = int_to_ptr.vmem [resolvable:$true] %s323_s26 }
  0x1a   : > { %s3823_s27 = sand.u32 1, %s3686_s16   ;;  %s3832_s29 = sand.u32 1, %s3682_s15  }
  0x1b   : > { %s4529_s24 = scalar_select %p3815_p10, 1, 0 }
  0x1c   : > { %p3153_p11 = pneg %p3815_p10  ;;  %p3836_p0 = pnand %p3178_p12, %p3801_p4 }
  0x1d   : > { %s3128_s11 = smul.u32 192, %s3832_s29  ;;  %s4532_s3 = sld [smem:[#allocation25_spill]] }
  0x1e   : > { %p3827_p13 = pnand %p3153_p11, %p4505_p5 }
  0x1f   : > { %s4531_s30 = scalar_select %p3836_p0, 1, 0 }
  0x20   : > { %s4530_s28 = scalar_select %p3827_p13, 1, 0 }
  0x21   : > { %p4511_p2 = pneg %p3827_p13 }
  0x23   : > { %s3400_s19 = scalar_lea.hbm %s4532_s3, 16 }
  0x24   : > { %p3401_p1 = scmp.ne.s32.totalorder %s4532_s3, %s3400_s19  ;;  %p3407_p4 = scmp.lt.u32.totalorder %s3400_s19, %s4532_s3 }
  0x26   : > { %p3403_p3 = pnand %p4511_p2, %p3401_p1 }
  0x28   : > { %p3404_p6 = pneg %p3403_p3 }
  0x2a   : > { %p3409_p7 = pnand %p3407_p4, %p3404_p6 }
  0x2c   : > { %3412 = shalt.err (!%p3409_p7)
}
  0x2d   : > { %s3413_s15 = scalar_lea.vmem %s324_s26, 16  ;;  %s3420_s12 = scalar_lea.vmem %s324_s26, 32 }
  0x2e   : > { %p3414_p11 = scmp.ne.s32.totalorder %s324_s26, %s3413_s15  ;;  %p3421_p5 = scmp.lt.s32.totalorder %s324_s26, %s324_s26 }
  0x2f   : > { %p3422_p8 = scmp.lt.s32.totalorder %s3420_s12, %s3413_s15 }
  0x30   : > { %p3416_p12 = pnand %p3414_p11, %p4511_p2 }
  0x31   : > { %p3423_p10 = por %p3422_p8, %p3421_p5 }
  0x32   : > { %p3417_p9 = pneg %p3416_p12 }
  0x34   : > { %p3424_p0 = pnand %p3423_p10, %p3417_p9 }
  0x36   : > { %3427 = shalt.err (!%p3424_p0)
}
  0x37   : > { %3159 = dma.hbm_to_vmem [thread:$0]  (!%p3827_p13), %s4532_s3, 16, %s324_s26, [#allocation7]  }
  0x38   : > { %s3129_s19 = smul.u32 3072, %s3686_s16  ;;  %s367_s20 = scalar_lea.vmem [#allocation9], %s3128_s11 }
  0x39   : > { %s374_s25 = sshll.u32 %s367_s20, 4  ;;  %s4533_s4 = sld [smem:[#allocation26_spill]]  ;;  %s3864_s25 = int_to_ptr.vmem [resolvable:$true] %s374_s25 }
  0x3a   : > { %s4516_s12 = scalar_lea.sflag [#allocation10], %s3823_s27  ;;  %p4534_p8 = scmp.ne.s32.totalorder %s4531_s30, 0 }
  0x3c   : > { %p3876_p9 = pneg %p4534_p8 }
  0x3e   : > { %s4535_s26 = scalar_select %p3876_p9, 1, 0 }
  0x3f   : > { %s3869_s15 = scalar_lea.hbm %s4533_s4, %s3129_s19  ;;  %s3433_s21 = scalar_lea.hbm %s4533_s4, 6144 }
  0x40   : > { %s3428_s13 = scalar_lea.hbm %s3869_s15, 3072  ;;  %p3434_p1 = scmp.lt.u32.totalorder %s3869_s15, %s4533_s4 }
  0x41   : > { %p3429_p5 = scmp.ne.s32.totalorder %s3869_s15, %s3428_s13  ;;  %p3435_p3 = scmp.lt.u32.totalorder %s3433_s21, %s3428_s13 }
  0x42   : > { %p3437_p4 = scmp.lt.u32.totalorder %s3428_s13, %s3869_s15 }
  0x43   : > { %p3431_p10 = pnand %p3876_p9, %p3429_p5  ;;  %p3436_p6 = por %p3435_p3, %p3434_p1 }
  0x45   : > { %p3432_p0 = pneg %p3431_p10  ;;  %p3438_p7 = por %p3437_p4, %p3436_p6 }
  0x47   : > { %p3439_p11 = pnand %p3438_p7, %p3432_p0 }
  0x49   : > { %3442 = shalt.err (!%p3439_p11)
}
  0x4a   : > { %s3443_s22 = scalar_lea.vmem %s3864_s25, 3072  ;;  %s3689_s11 = smov [#allocation9]  }
  0x4b   : > { %p3444_p12 = scmp.ne.s32.totalorder %s3864_s25, %s3443_s22  ;;  %s3448_s18 = sshll.u32 %s3689_s11, 4  ;;  %s3449_s18 = int_to_ptr.vmem [resolvable:$false] %s3448_s18 }
  0x4c   : > { %s3450_s19 = scalar_lea.vmem %s3449_s18, 6144  ;;  %p3451_p2 = scmp.lt.s32.totalorder %s3864_s25, %s3449_s18 }
  0x4d   : > { %p3446_p5 = pnand %p3444_p12, %p3876_p9  ;;  %p3452_p13 = scmp.lt.s32.totalorder %s3450_s19, %s3443_s22 }
  0x4f   : > { %p3447_p10 = pneg %p3446_p5  ;;  %p3453_p1 = por %p3452_p13, %p3451_p2 }
  0x51   : > { %p3454_p3 = pnand %p3453_p1, %p3447_p10 }
  0x53   : > { %3457 = shalt.err (!%p3454_p3)
}
  0x54   : > { %s3690_s13 = smov 192   ;;  %s3691_s21 = smov 12  }
  0x55   : > { %3166 = dma.hbm_to_vmem [thread:$0]  (!%p4534_p8), %s3869_s15, 3072, %s3864_s25, %s4516_s12, %s3690_s13, %s3690_s13, %s3691_s21  }
  0x56   : > { %s2777_s20 = sshll.u32 %s3832_s29, 8  ;;  %s2903_s11 = sshll.u32 %s3686_s16, 12 }
  0x57   : > { %s3906_s19 = scalar_lea.hbm %s4499_s6, %s2903_s11  ;;  %s409_s3 = scalar_lea.vmem [#allocation12], %s2777_s20 }
  0x58   : > { %s416_s4 = sshll.u32 %s409_s3, 4  ;;  %s406_s10 = scalar_lea.sflag [#allocation13], %s3823_s27  ;;  %s3908_s4 = int_to_ptr.vmem [resolvable:$true] %s416_s4 }
  0x59   : > { %s3458_s9 = scalar_lea.hbm %s3906_s19, 4096  ;;  %s3463_s13 = scalar_lea.hbm %s4499_s6, 8192 }
  0x5a   : > { %p3459_p13 = scmp.ne.s32.totalorder %s3906_s19, %s3458_s9  ;;  %p3464_p6 = scmp.lt.u32.totalorder %s3906_s19, %s4499_s6 }
  0x5b   : > { %p3465_p4 = scmp.lt.u32.totalorder %s3463_s13, %s3458_s9  ;;  %p3467_p11 = scmp.lt.u32.totalorder %s3458_s9, %s3906_s19 }
  0x5c   : > { %p3461_p2 = pnand %p3459_p13, %p3876_p9 }
  0x5d   : > { %p3466_p7 = por %p3465_p4, %p3464_p6 }
  0x5e   : > { %p3462_p0 = pneg %p3461_p2 }
  0x5f   : > { %p3468_p12 = por %p3467_p11, %p3466_p7 }
  0x61   : > { %p3469_p5 = pnand %p3468_p12, %p3462_p0 }
  0x63   : > { %3472 = shalt.err (!%p3469_p5)
}
  0x64   : > { %s3473_s3 = scalar_lea.vmem %s3908_s4, 4096  ;;  %s3692_s20 = smov [#allocation12]  }
  0x65   : > { %p3474_p10 = scmp.ne.s32.totalorder %s3908_s4, %s3473_s3  ;;  %s3478_s18 = sshll.u32 %s3692_s20, 4  ;;  %s3479_s18 = int_to_ptr.vmem [resolvable:$false] %s3478_s18 }
  0x66   : > { %s3480_s22 = scalar_lea.vmem %s3479_s18, 8192  ;;  %p3481_p13 = scmp.lt.s32.totalorder %s3908_s4, %s3479_s18 }
  0x67   : > { %p3476_p1 = pnand %p3474_p10, %p3876_p9  ;;  %p3482_p2 = scmp.lt.s32.totalorder %s3480_s22, %s3473_s3 }
  0x69   : > { %p3477_p3 = pneg %p3476_p1  ;;  %p3483_p6 = por %p3482_p2, %p3481_p13 }
  0x6b   : > { %p3484_p4 = pnand %p3483_p6, %p3477_p3 }
  0x6d   : > { %3487 = shalt.err (!%p3484_p4)
}
  0x6e   : > { %s3693_s9 = smov 256   ;;  %s3694_s25 = smov 16  }
  0x6f   : > { %3172 = dma.hbm_to_vmem [thread:$0]  (!%p4534_p8), %s3906_s19, 4096, %s3908_s4, %s406_s10, %s3693_s9, %s3693_s9, %s3694_s25  }
  0x70   : > { %s3695_s15 = smov [#allocation3]   ;;  %s3488_s3 = scalar_lea.hbm %s4493_s0, 256 }
  0x71   : > { %s309_s13 = sshll.u32 %s3695_s15, 4  ;;  %p3489_p0 = scmp.ne.s32.totalorder %s4493_s0, %s3488_s3  ;;  %s310_s13 = int_to_ptr.vmem [resolvable:$true] %s309_s13 }
  0x72   : > { %p4536_p7 = scmp.ne.s32.totalorder %s4530_s28, 0  ;;  %p3495_p10 = scmp.lt.u32.totalorder %s3488_s3, %s4493_s0 }
  0x74   : > { %p4537_p11 = pneg %p4536_p7 }
  0x76   : > { %p3491_p12 = pnand %p3489_p0, %p4537_p11 }
  0x78   : > { %p3492_p5 = pneg %p3491_p12 }
  0x7a   : > { %p3497_p1 = pnand %p3495_p10, %p3492_p5 }
  0x7c   : > { %3500 = shalt.err (!%p3497_p1)
}
  0x7d   : > { %s3501_s4 = scalar_lea.vmem %s310_s13, 256  ;;  %p4538_p13 = pmov %p4537_p11 }
  0x7e   : > { %p3502_p3 = scmp.ne.s32.totalorder %s310_s13, %s3501_s4  ;;  %p3509_p4 = scmp.lt.s32.totalorder %s310_s13, %s310_s13 }
  0x7f   : > { %p3510_p8 = scmp.lt.s32.totalorder %s3501_s4, %s3501_s4 }
  0x80   : > { %p3504_p2 = pnand %p3502_p3, %p4538_p13 }
  0x81   : > { %p3511_p9 = por %p3510_p8, %p3509_p4 }
  0x82   : > { %p3505_p6 = pneg %p3504_p2 }
  0x84   : > { %p3512_p0 = pnand %p3511_p9, %p3505_p6 }
  0x86   : > { %3515 = shalt.err (!%p3512_p0)
}
  0x87   : > { %s3696_s19 = smov 128   ;;  %s3697_s12 = smov 8  }
  0x88   : > { %3156 = dma.hbm_to_vmem [thread:$0]  (!%p4536_p7), %s4493_s0, 256, %s310_s13, [#allocation4], %s3696_s19, %s3696_s19, %s3697_s12  }
  0x89   : > { %s2772_s15 = sshll.u32 %s3686_s16, 4  ;;  %s349_s21 = scalar_lea.vmem [#allocation6], %s3832_s29 }
  0x8a   : > { %s356_s11 = sshll.u32 %s349_s21, 4  ;;  %s3959_s18 = scalar_lea.hbm %s4495_s2, %s2772_s15  ;;  %s357_s11 = int_to_ptr.vmem [resolvable:$true] %s356_s11 }
  0x8b   : > { %s347_s22 = scalar_lea.sflag [#allocation7], %s3823_s27  ;;  %s3516_s4 = scalar_lea.hbm %s3959_s18, 16 }
  0x8c   : > { %p3517_p8 = scmp.ne.s32.totalorder %s3959_s18, %s3516_s4  ;;  %p4539_p9 = scmp.ne.s32.totalorder %s4535_s26, 0 }
  0x8d   : > { %s3521_s19 = scalar_lea.hbm %s4495_s2, 32  ;;  %p3522_p7 = scmp.lt.u32.totalorder %s3959_s18, %s4495_s2 }
  0x8e   : > { %p3519_p11 = pnand %p3517_p8, %p4539_p9  ;;  %p3523_p5 = scmp.lt.u32.totalorder %s3521_s19, %s3516_s4 }
  0x8f   : > { %p3525_p1 = scmp.lt.u32.totalorder %s3516_s4, %s3959_s18 }
  0x90   : > { %p3520_p12 = pneg %p3519_p11  ;;  %p3524_p10 = por %p3523_p5, %p3522_p7 }
  0x92   : > { %p3526_p3 = por %p3525_p1, %p3524_p10 }
  0x94   : > { %p3527_p13 = pnand %p3526_p3, %p3520_p12 }
  0x96   : > { %3530 = shalt.err (!%p3527_p13)
}
  0x97   : > { %s3531_s25 = scalar_lea.vmem %s357_s11, 16  ;;  %s3698_s15 = smov [#allocation6]  }
  0x98   : > { %p3532_p2 = scmp.ne.s32.totalorder %s357_s11, %s3531_s25  ;;  %s3536_s21 = sshll.u32 %s3698_s15, 4  ;;  %s3537_s21 = int_to_ptr.vmem [resolvable:$false] %s3536_s21 }
  0x99   : > { %s3538_s3 = scalar_lea.vmem %s3537_s21, 32  ;;  %p3539_p0 = scmp.lt.s32.totalorder %s357_s11, %s3537_s21 }
  0x9a   : > { %p3534_p6 = pnand %p3532_p2, %p4539_p9  ;;  %p3540_p8 = scmp.lt.s32.totalorder %s3538_s3, %s3531_s25 }
  0x9c   : > { %p3535_p4 = pneg %p3534_p6  ;;  %p3541_p11 = por %p3540_p8, %p3539_p0 }
  0x9e   : > { %p3542_p5 = pnand %p3541_p11, %p3535_p4 }
  0xa0   : > { %3545 = shalt.err (!%p3542_p5)
}
  0xa1   : > { %p4540_p7 = scmp.ne.s32.totalorder %s4531_s30, 0  ;;  %s2774_s20 = sshll.u32 %s3832_s29, 6 }
  0xa2   : > { %s2902_s4 = sshll.u32 %s3686_s16, 10  ;;  %s388_s12 = scalar_lea.vmem [#allocation11], %s2774_s20 }
  0xa3   : > { %3163 = dma.hbm_to_vmem [thread:$0]  (!%p4540_p7), %s3959_s18, 16, %s357_s11, %s347_s22  }
  0xa4   : > { %s3984_s19 = scalar_lea.hbm %s4498_s5, %s2902_s4  ;;  %s395_s9 = sshll.u32 %s388_s12, 4  ;;  %s3986_s9 = int_to_ptr.vmem [resolvable:$true] %s395_s9 }
  0xa5   : > { %s3546_s25 = scalar_lea.hbm %s3984_s19, 1024  ;;  %s3551_s22 = scalar_lea.hbm %s4498_s5, 2048 }
  0xa6   : > { %p3547_p12 = scmp.ne.s32.totalorder %s3984_s19, %s3546_s25  ;;  %p3552_p3 = scmp.lt.u32.totalorder %s3984_s19, %s4498_s5 }
  0xa7   : > { %p3553_p13 = scmp.lt.u32.totalorder %s3551_s22, %s3546_s25  ;;  %p3555_p6 = scmp.lt.u32.totalorder %s3546_s25, %s3984_s19 }
  0xa8   : > { %p3549_p10 = pnand %p3547_p12, %p4539_p9 }
  0xa9   : > { %p3554_p2 = por %p3553_p13, %p3552_p3 }
  0xaa   : > { %p3550_p1 = pneg %p3549_p10 }
  0xab   : > { %p3556_p4 = por %p3555_p6, %p3554_p2 }
  0xad   : > { %p3557_p0 = pnand %p3556_p4, %p3550_p1 }
  0xaf   : > { %3560 = shalt.err (!%p3557_p0)
}
  0xb0   : > { %s3561_s3 = scalar_lea.vmem %s3986_s9, 1024  ;;  %s3699_s20 = smov [#allocation11]  }
  0xb1   : > { %p3562_p8 = scmp.ne.s32.totalorder %s3986_s9, %s3561_s3  ;;  %s3566_s4 = sshll.u32 %s3699_s20, 4  ;;  %s3567_s4 = int_to_ptr.vmem [resolvable:$false] %s3566_s4 }
  0xb2   : > { %s3568_s28 = scalar_lea.vmem %s3567_s4, 2048  ;;  %p3569_p12 = scmp.lt.s32.totalorder %s3986_s9, %s3567_s4 }
  0xb3   : > { %p3564_p11 = pnand %p3562_p8, %p4539_p9  ;;  %p3570_p10 = scmp.lt.s32.totalorder %s3568_s28, %s3561_s3 }
  0xb5   : > { %p3565_p5 = pneg %p3564_p11  ;;  %p3571_p3 = por %p3570_p10, %p3569_p12 }
  0xb7   : > { %p3572_p13 = pnand %p3571_p3, %p3565_p5 }
  0xb9   : > { %3575 = shalt.err (!%p3572_p13)
}
  0xba   : > { %s3700_s13 = smov 64   ;;  %s3701_s12 = smov 4  }
  0xbb   : > { %s4541_s25 = scalar_lea.sflag [#allocation10], %s3823_s27  ;;  %s2780_s11 = sshll.u32 %s3832_s29, 7 }
  0xbc   : > { %3169 = dma.hbm_to_vmem [thread:$0]  (!%p4540_p7), %s3984_s19, 1024, %s3986_s9, %s4541_s25, %s3700_s13, %s3700_s13, %s3701_s12  }
  0xbd   : > { %s2904_s18 = sshll.u32 %s3686_s16, 11  ;;  %s430_s3 = scalar_lea.vmem [#allocation14], %s2780_s11 }
  0xbe   : > { %s4019_s21 = scalar_lea.hbm %s4500_s7, %s2904_s18  ;;  %s437_s20 = sshll.u32 %s430_s3, 4  ;;  %s4021_s20 = int_to_ptr.vmem [resolvable:$true] %s437_s20 }
  0xbf   : > { %s3576_s4 = scalar_lea.hbm %s4019_s21, 2048  ;;  %s3581_s19 = scalar_lea.hbm %s4500_s7, 4096 }
  0xc0   : > { %p3577_p1 = scmp.ne.s32.totalorder %s4019_s21, %s3576_s4  ;;  %p3582_p4 = scmp.lt.u32.totalorder %s4019_s21, %s4500_s7 }
  0xc1   : > { %p3583_p0 = scmp.lt.u32.totalorder %s3581_s19, %s3576_s4  ;;  %p3585_p11 = scmp.lt.u32.totalorder %s3576_s4, %s4019_s21 }
  0xc2   : > { %p3579_p2 = pnand %p3577_p1, %p4539_p9 }
  0xc3   : > { %p3584_p8 = por %p3583_p0, %p3582_p4 }
  0xc4   : > { %p3580_p6 = pneg %p3579_p2 }
  0xc5   : > { %p3586_p5 = por %p3585_p11, %p3584_p8 }
  0xc7   : > { %p3587_p12 = pnand %p3586_p5, %p3580_p6 }
  0xc9   : > { %3590 = shalt.err (!%p3587_p12)
}
  0xca   : > { %s3591_s25 = scalar_lea.vmem %s4021_s20, 2048  ;;  %s3702_s11 = smov [#allocation14]  }
  0xcb   : > { %p3592_p10 = scmp.ne.s32.totalorder %s4021_s20, %s3591_s25  ;;  %s3596_s18 = sshll.u32 %s3702_s11, 4  ;;  %s3597_s18 = int_to_ptr.vmem [resolvable:$false] %s3596_s18 }
  0xcc   : > { %s3598_s22 = scalar_lea.vmem %s3597_s18, 4096  ;;  %p3599_p1 = scmp.lt.s32.totalorder %s4021_s20, %s3597_s18 }
  0xcd   : > { %p3594_p3 = pnand %p3592_p10, %p4539_p9  ;;  %p3600_p2 = scmp.lt.s32.totalorder %s3598_s22, %s3591_s25 }
  0xcf   : > { %p3595_p13 = pneg %p3594_p3  ;;  %p3601_p4 = por %p3600_p2, %p3599_p1 }
  0xd1   : > { %p3602_p0 = pnand %p3601_p4, %p3595_p13 }
  0xd3   : > { %3605 = shalt.err (!%p3602_p0)
}
  0xd4   : > { %3175 = dma.hbm_to_vmem [thread:$0]  (!%p4540_p7), %s4019_s21, 2048, %s4021_s20, %s406_s10, %s3700_s13, %s3700_s13, %s3701_s12  }
  0xd5   : > { %p4542_p9 = scmp.ne.s32.totalorder %s4529_s24, 0 }
  0xd6   : > { %p4543_p6 = scmp.eq.s32.totalorder (!%p4542_p9), %s3786_s17, 0 }
  0xd7   : > { %449 = sbr.rel (%p4542_p9) target bundleno = 4621 (0x120d), region = 60 }
  0xde   : > { %3649 = dma.done.wait (%p4543_p6), [#allocation4], 256   ;;  %p4544_p8 = pmov %p4543_p6 }
  0xdf   : > { %s455_s30 = sand.u32 1, %s3786_s17   ;;  %s4057_s26 = sand.u32 1, %s3678_s14  }
  0xe0   : > { %3651 = vsyncadd (%p4544_p8), [#allocation4], 4294967040  ;;  %s456_s27 = scalar_lea.sflag [#allocation7], %s455_s30  ;;  %s458_s15 = scalar_lea.vmem [#allocation6], %s4057_s26 }
  0xe1   : > { %p4545_p11 = scmp.ne.s32.totalorder %s4528_s23, 0 }
  0xe3   : > { %3653 = dma.done.wait (%p4545_p11), %s456_s27, 16  }
  0xe4   : > { %3655 = vsyncadd (%p4545_p11), %s456_s27, 4294967280  ;;  %p4546_p7 = pmov %p4543_p6 }
  0xe5   : > { %p4547_p5 = pmov %p4543_p6 }
  0xe6   : > { %3657 = dma.done.wait (%p4546_p7), [#allocation7], 16  }
  0xe7   : > { %3659 = vsyncadd (%p4547_p5), [#allocation7], 4294967280  ;;  %s3130_s10 = smul.u32 192, %s4057_s26  ;;  %s468_s24 = scalar_lea.sflag [#allocation10], %s455_s30 }
  0xe9   : > { %s4069_s13 = scalar_lea.vmem [#allocation9], %s3130_s10 }
  0xea   : > { %3661 = dma.done.wait (%p4545_p11), %s468_s24, 4096  }
  0xeb   : > { %3663 = vsyncadd (%p4545_p11), %s468_s24, 4294963200  ;;  %s2786_s12 = sshll.u32 %s4057_s26, 6  ;;  %s2787_s21 = sshll.u32 %s4057_s26, 8 }
  0xec   : > { %s4077_s3 = scalar_lea.vmem [#allocation11], %s2786_s12  ;;  %s486_s20 = scalar_lea.sflag [#allocation13], %s455_s30 }
  0xed   : > { %s4079_s4 = scalar_lea.vmem [#allocation12], %s2787_s21 }
  0xee   : > { %3665 = dma.done.wait (%p4545_p11), %s486_s20, 6144  }
  0xef   : > { %3667 = vsyncadd (%p4545_p11), %s486_s20, 4294961152  ;;  %s2788_s29 = sshll.u32 %s4057_s26, 7  ;;  %p552_p12 = scmp.lt.s32.totalorder %s3786_s17, 1 }
  0xf0   : > { %s4094_s25 = scalar_lea.vmem [#allocation14], %s2788_s29  ;;  %p4548_p10 = scmp.ne.s32.totalorder %s3786_s17, 0 }
  0xf1   : > { %s4088_s16 = scalar_select %p552_p12, %s3786_s17, 1 }
  0xf2   : > { %559 = sbr.rel (%p4548_p10) target bundleno = 249 (0xf9), region = 92  ;;  %v560_v0 = vld [vmem:[#allocation3] sm:$0xff] (!%p4548_p10)  ;;  %v561_v1 = vld [vmem:[#allocation3 + $0x8] sm:$0xff] (!%p4548_p10) }
  0xf3   : > { %s554_s28 = scalar_lea.vmem %s4494_s1, %s4088_s16  ;;  %562 = vst [vmem:[#allocation2] sm:$0xff] (!%p4548_p10), %v560_v0  ;;  %563 = vst [vmem:[#allocation2 + $0x8] sm:$0xff] (!%p4548_p10), %v561_v1 }
  0xf9 PF: > { %v3234_v5 = vld [vmem:[%s4069_s13 + $0x4] ss:$12 sps:$4 sm:$0xff]   ;;  %v3703_v6 = vmov 0.0   ;;  %v3236_v7 = vld [vmem:[%s4069_s13] ss:$12 sps:$4 sm:$0xff]   ;;  %v3704_v28 = vmov 0   ;;  %v839_v46 = vlaneseq }
  0xfa   : > { %v4098_v2 = vld [vmem:[#allocation2] sm:$0xff]  ;;  %v4100_v3 = vld [vmem:[#allocation2 + $0x8] sm:$0xff]  ;;  %2980 = vmatprep.subr.bf16.mxu1 %v3703_v6  ;;  %755 = vmatprep.subr.bf16.mxu0 %v3234_v5  ;;  %v3246_v16 = vld [vmem:[%s4069_s13 + $0x4c] ss:$12 sps:$4 sm:$0xff]   ;;  %vm3705_vm0 = vmmov 0   ;;  %s3706_s18 = smov 1  }
  0xfb   : > { %v571_v4 = vmul.f32 %v4098_v2, %v4098_v2  ;;  %v3237_v8 = vld [vmem:[%s4069_s13 + $0x8] ss:$12 sps:$4 sm:$0xff]   ;;  %v572_v9 = vmul.f32 %v4100_v3, %v4100_v3  ;;  %756 = vmatpush1.bf16.msra.mxu0 %v3236_v7  ;;  %v3240_v11 = vld [vmem:[%s4069_s13 + $0x18] ss:$12 sps:$4 sm:$0xff]   ;;  %v3241_v12 = vld [vmem:[%s4069_s13 + $0x20] ss:$12 sps:$4 sm:$0xff]   ;;  %787 = vmatprep.mubr.bf16.mxu0 %v3704_v28 }
  0xfc   : > { %v3238_v10 = vld [vmem:[%s4069_s13 + $0x1c] ss:$12 sps:$4 sm:$0xff]   ;;  %2981 = vmatpush3.bf16.msra.mxu1 %v3237_v8  ;;  %v3242_v13 = vld [vmem:[%s4069_s13 + $0x34] ss:$12 sps:$4 sm:$0xff]   ;;  %v3245_v15 = vld [vmem:[%s4069_s13 + $0x38] ss:$12 sps:$4 sm:$0xff]   ;;  %2996 = vmatprep.mubr.msk.bf16.mxu1 %vm3705_vm0, %v3703_v6 }
  0xfd   : > { %573 = vadd.xlane.f32.xlu0 %v571_v4  ;;  %757 = vmatprep.subr.bf16.mxu0 %v3238_v10  ;;  %v3244_v14 = vld [vmem:[%s4069_s13 + $0x30] ss:$12 sps:$4 sm:$0xff]   ;;  %v3248_v17 = vld [vmem:[%s4069_s13 + $0x48] ss:$12 sps:$4 sm:$0xff]   ;;  %v3252_v20 = vld [vmem:[%s4069_s13 + $0x60] ss:$12 sps:$4 sm:$0xff]  }
  0xfe   : > { %2982 = vmatprep.subr.bf16.mxu1 %v3703_v6  ;;  %v3249_v18 = vld [vmem:[%s4069_s13 + $0x50] ss:$12 sps:$4 sm:$0xff]   ;;  %v3253_v21 = vld [vmem:[%s4069_s13 + $0x68] ss:$12 sps:$4 sm:$0xff]   ;;  %v3256_v23 = vld [vmem:[%s4069_s13 + $0x78] ss:$12 sps:$4 sm:$0xff]  }
  0xff   : > { %758 = vmatpush1.bf16.msra.mxu0 %v3240_v11  ;;  %v3250_v19 = vld [vmem:[%s4069_s13 + $0x64] ss:$12 sps:$4 sm:$0xff]   ;;  %v3254_v22 = vld [vmem:[%s4069_s13 + $0x7c] ss:$12 sps:$4 sm:$0xff]   ;;  %v3257_v24 = vld [vmem:[%s4069_s13 + $0x80] ss:$12 sps:$4 sm:$0xff]  }
 0x100   : > { %2983 = vmatpush3.bf16.msra.mxu1 %v3241_v12  ;;  %759 = vmatprep.subr.bf16.mxu0 %v3242_v13  ;;  %v3258_v25 = vld [vmem:[%s4069_s13 + $0x94] ss:$12 sps:$4 sm:$0xff]   ;;  %v3260_v26 = vld [vmem:[%s4069_s13 + $0x90] ss:$12 sps:$4 sm:$0xff]   ;;  %v3261_v27 = vld [vmem:[%s4069_s13 + $0x98] ss:$12 sps:$4 sm:$0xff]  }
 0x101   : > { %575 = vadd.xlane.f32.xlu0 %v572_v9  ;;  %2984 = vmatprep.subr.bf16.mxu1 %v3703_v6  ;;  %v3262_v29 = vld [vmem:[%s4069_s13 + $0xac] ss:$12 sps:$4 sm:$0xff]   ;;  %v3264_v30 = vld [vmem:[%s4069_s13 + $0xa8] ss:$12 sps:$4 sm:$0xff]   ;;  %v3265_v31 = vld [vmem:[%s4069_s13 + $0xb0] ss:$12 sps:$4 sm:$0xff]  }
 0x102   : > { %v2790_v41 = vld [vmem:[%s554_s28] ss:$0 sm:$0xff]  ;;  %v840_v47 = vand.u32 127, %v839_v46  ;;  %v887_v48 = vshrl.u32 %v839_v46, 7  ;;  %s3707_s22 = smov 127   ;;  %s4553_s13 = sld [smem:[#allocation27_spill]] }
 0x103   : > { %760 = vmatpush1.bf16.msra.mxu0 %v3244_v14  ;;  %v566_v61 = vld [vmem:[%s4501_s8] sm:$0xff]  ;;  %vm911_vm3 = vcmask 261120   ;;  %v567_v11 = vld [vmem:[%s4501_s8 + $0x8] sm:$0xff]  ;;  %vm1038_vm4 = vcmask 1043456   ;;  %vm1010_vm5 = vcmask 64512   ;;  %s3708_s19 = smov 96  }
 0x104   : > { %2985 = vmatpush3.bf16.msra.mxu1 %v3245_v15  ;;  %761 = vmatprep.subr.bf16.mxu0 %v3246_v16  ;;  %vm4154_vm1 = vcmp.le.s32.totalorder %v840_v47, %v887_v48  ;;  %v845_v59 = vand.u32 1, %v840_v47  ;;  %s3709_s9 = smov 64   ;;  %s3710_s28 = smov 32  }
 0x105   : > { %2986 = vmatprep.subr.bf16.mxu1 %v3703_v6  ;;  %p2896_p3 = scmp.ne.s32.totalorder %s3786_s17, 1 }
 0x106   : > { %vm4163_vm2 = vcmp.eq.s32.totalorder %v845_v59, 0  ;;  %vm2564_vm6 = vcmask (!%p2896_p3), 1040384   ;;  %vm2560_vm7 = vcmask (!%p2896_p3), 1047559  }
 0x107   : > { %762 = vmatpush1.bf16.msra.mxu0 %v3248_v17 }
 0x108   : > { %2987 = vmatpush3.bf16.msra.mxu1 %v3249_v18  ;;  %763 = vmatprep.subr.bf16.mxu0 %v3250_v19  ;;  %s4554_s12 = smov %s4553_s13  ;;  %v568_v1 = vld [vmem:[%s4553_s13] sm:$0xff] }
 0x109   : > { %2988 = vmatprep.subr.bf16.mxu1 %v3703_v6  ;;  %v569_v12 = vld [vmem:[%s4554_s12 + $0x8] sm:$0xff] }
 0x10b   : > { %764 = vmatpush1.bf16.msra.mxu0 %v3252_v20 }
 0x10c   : > { %2989 = vmatpush3.bf16.msra.mxu1 %v3253_v21  ;;  %765 = vmatprep.subr.bf16.mxu0 %v3254_v22 }
 0x10d   : > { %2990 = vmatprep.subr.bf16.mxu1 %v3703_v6 }
 0x10f   : > { %766 = vmatpush1.bf16.msra.mxu0 %v3256_v23 }
 0x110   : > { %2991 = vmatpush3.bf16.msra.mxu1 %v3257_v24  ;;  %767 = vmatprep.subr.bf16.mxu0 %v3258_v25 }
 0x111   : > { %2992 = vmatprep.subr.bf16.mxu1 %v3703_v6 }
 0x113   : > { %768 = vmatpush1.bf16.msra.mxu0 %v3260_v26 }
 0x114   : > { %2993 = vmatpush3.bf16.msra.mxu1 %v3261_v27  ;;  %769 = vmatprep.subr.bf16.mxu0 %v3262_v29 }
 0x115   : > { %2994 = vmatprep.subr.bf16.mxu1 %v3703_v6 }
 0x117   : > { %770 = vmatpush1.bf16.msra.mxu0 %v3264_v30 }
 0x118   : > { %2995 = vmatpush3.bf16.msra.mxu1 %v3265_v31  ;;  %3024 = vmatprep.subr.bf16.mxu0 %v3703_v6 }
 0x119   : > { %3000 = vmatprep.subr.bf16.mxu1 %v3703_v6 }
 0x18a   : > { %v574_v32 = vpop.xlane.xlu0 %573 }
 0x18b   : > { %v578_v33 = vmul.f32 0.0078125, %v574_v32 }
 0x18d   : > { %v580_v34 = vadd.f32 1e-06, %v578_v33 }
 0x18e   : > { %v576_v35 = vpop.xlane.xlu0 %575 }
 0x18f   : > { %3338 = vrsqrt.f32 %v580_v34  ;;  %v579_v36 = vmul.f32 0.0078125, %v576_v35 }
 0x191   : > { %v581_v37 = vadd.f32 1e-06, %v579_v36 }
 0x193   : > { %3340 = vrsqrt.f32 %v581_v37 }
 0x199   : > { %v3339_v38 = vpop.eup %3338 }
 0x19a   : > { %v584_v39 = vmul.f32 %v3339_v38, %v4098_v2 }
 0x19c   : > { %v592_v43 = vmul.f32 %v2790_v41, %v584_v39 }
 0x19d   : > { %v3341_v40 = vpop.eup %3340 }
 0x19e   : > { %v585_v42 = vmul.f32 %v3341_v40, %v4100_v3 }
 0x1a0   : > { %v593_v44 = vmul.f32 %v2790_v41, %v585_v42 }
 0x1a2   : > { %v594_v45 = vpack.c.bf16 %v593_v44, %v592_v43 }
 0x1a4   : > { %788 = vmatmul.mubr.bf16.vlgmr.msra.gmra.mrb[0].mxu0 %v594_v45  ;;  %2997 = vmatmul.mubr.bf16.vlgmr.msra.gmra.mrb[0].mxu1 %v594_v45 }
 0x1a5   : > { %3002 = vmatprep.mubr.msk.bf16.mxu1 %vm3705_vm0, %v3703_v6  ;;  %3026 = vmatprep.mubr.msk.bf16.mxu0 %vm3705_vm0, %v3703_v6 }
 0x277   : > { %v789_v50 = vpop.f32.mrb[0].mxu0  ;;  %v832_v51 = vpop.f32.mrb[0].mxu1 }
 0x278   : > { %v2998_v52 = vpop.f32.mrb[1].mxu1  ;;  %858 = vrot.lane.b32.xlu1 %v789_v50, %s3706_s18  ;;  %854 = vrot.lane.b32.xlu0 %v789_v50, %s3707_s22  ;;  %v791_v53 = vpop.f32.mrb[1].mxu0  ;;  %v864_v13 = vmul.f32 %v789_v50, %v566_v61  ;;  %v4200_v30 = vpack.c.bf16 %v832_v51, %v832_v51 }
 0x279   : > { %v793_v54 = vpop.f32.mrb[2].mxu0  ;;  %v4158_v55 = vpop.f32.mrb[2].mxu1  ;;  %v880_v3 = vmul.f32 %v791_v53, %v566_v61 }
 0x27a   : > { %v795_v56 = vpop.f32.mrb[3].mxu0  ;;  %v2999_v57 = vpop.f32.mrb[3].mxu1  ;;  %v865_v27 = vmul.f32 %v793_v54, %v567_v11  ;;  %v1040_v33 = vsel %vm1038_vm4, %v4200_v30, 0 }
 0x27b   : > { %v881_v17 = vmul.f32 %v795_v56, %v567_v11 }
 0x27c   : > { %870 = vrot.lane.b32.xlu1 %v791_v53, %s3707_s22 }
 0x280   : > { %874 = vrot.lane.b32.xlu1 %v791_v53, %s3706_s18 }
 0x284   : > { %872 = vrot.lane.b32.xlu1 %v795_v56, %s3707_s22 }
 0x288   : > { %876 = vrot.lane.b32.xlu1 %v795_v56, %s3706_s18 }
 0x28c   : > { %856 = vrot.lane.b32.xlu1 %v793_v54, %s3707_s22 }
 0x290   : > { %860 = vrot.lane.b32.xlu1 %v793_v54, %s3706_s18 }
 0x2ea   : > { %v859_v58 = vpop.permute.xlu1 %858  ;;  %v855_v63 = vpop.permute.xlu0 %854 }
 0x2eb   : > { %v862_v5 = vsel %vm4163_vm2, %v855_v63, %v859_v58 }
 0x2ec   : > { %v866_v9 = vmul.f32 %v862_v5, %v568_v1 }
 0x2ee   : > { %v871_v60 = vpop.permute.xlu1 %870  ;;  %v868_v18 = vadd.f32 %v866_v9, %v864_v13 }
 0x2f0   : > { %v4187_v22 = vpack.c.bf16 %v868_v18, %v868_v18 }
 0x2f2   : > { %v875_v0 = vpop.permute.xlu1 %874 }
 0x2f3   : > { %v878_v2 = vsel %vm4163_vm2, %v871_v60, %v875_v0 }
 0x2f4   : > { %v882_v4 = vmul.f32 %v878_v2, %v568_v1  ;;  %v4231_v1 = vpack.c.bf16 %v4158_v55, %v4158_v55 }
 0x2f6   : > { %v884_v7 = vadd.f32 %v882_v4, %v880_v3  ;;  %v873_v8 = vpop.permute.xlu1 %872 }
 0x2f8   : > { %v4174_v10 = vpack.c.bf16 %v884_v7, %v884_v7  ;;  %v1086_v7 = vsel %vm1038_vm4, %v4231_v1, 0 }
 0x2fa   : > { %v877_v14 = vpop.permute.xlu1 %876  ;;  %v916_v15 = vsel %vm911_vm3, %v4174_v10, 0 }
 0x2fb   : > { %v879_v16 = vsel %vm4163_vm2, %v873_v8, %v877_v14  ;;  %3001 = vmatpush3.bf16.xpose.msra.mxu1 %v916_v15 }
 0x2fc   : > { %v883_v19 = vmul.f32 %v879_v16, %v569_v12  ;;  %3006 = vmatprep.subr.bf16.mxu1 %v3703_v6 }
 0x2fe   : > { %v885_v20 = vadd.f32 %v883_v19, %v881_v17  ;;  %v857_v21 = vpop.permute.xlu1 %856 }
 0x300   : > { %v4189_v23 = vpack.c.bf16 %v885_v20, %v885_v20 }
 0x302   : > { %3003 = vmatmul.mubr.msk.bf16.vlgmr.msra.gmra.mrb[4].mxu1 %vm911_vm3, %v4187_v22  ;;  %v861_v24 = vpop.permute.xlu1 %860  ;;  %v962_v25 = vsel %vm911_vm3, %v4189_v23, 0 }
 0x303   : > { %v863_v26 = vsel %vm4163_vm2, %v857_v21, %v861_v24  ;;  %3007 = vmatpush3.bf16.xpose.msra.mxu1 %v962_v25  ;;  %3008 = vmatprep.mubr.msk.bf16.mxu1 %vm3705_vm0, %v3703_v6 }
 0x304   : > { %v867_v29 = vmul.f32 %v863_v26, %v569_v12  ;;  %3012 = vmatprep.subr.bf16.mxu1 %v3703_v6 }
 0x306   : > { %v869_v31 = vadd.f32 %v867_v29, %v865_v27 }
 0x308   : > { %v4202_v32 = vpack.c.bf16 %v869_v31, %v869_v31 }
 0x30a   : > { %3009 = vmatmul.mubr.msk.bf16.vlgmr.msra.gmra.mrb[8].mxu1 %vm911_vm3, %v4202_v32 }
 0x30b   : > { %3013 = vmatpush3.bf16.msra.mxu1 %v1040_v33  ;;  %3014 = vmatprep.mubr.msk.bf16.mxu1 %vm3705_vm0, %v3703_v6 }
 0x30c   : > { %3018 = vmatprep.subr.bf16.mxu1 %v3703_v6 }
 0x3d5   : > { %v952_v34 = vpop.f32.mrb[4].mxu1 }
 0x3d6   : > { %v1004_v35 = vmul.f32 0.17677669, %v952_v34  ;;  %v3004_v36 = vpop.f32.mrb[5].mxu1 }
 0x3d7   : > { %v955_v37 = vpop.f32.mrb[6].mxu1 }
 0x3d8   : > { %v3005_v38 = vpop.f32.mrb[7].mxu1  ;;  %v1008_v39 = vsel %vm4154_vm1, %v1004_v35, -1e+30 }
 0x3d9   : > { %v1011_v40 = vsel %vm1010_vm5, %v1008_v39, -inf }
 0x3da   : > { %1012 = vmax.xlane.f32.xlu1 %v1011_v40 }
 0x3dd   : > { %v998_v41 = vpop.f32.mrb[8].mxu1 }
 0x3de   : > { %v1005_v42 = vmul.f32 0.17677669, %v998_v41  ;;  %v3010_v43 = vpop.f32.mrb[9].mxu1 }
 0x3df   : > { %v1001_v44 = vpop.f32.mrb[10].mxu1 }
 0x3e0   : > { %v3011_v45 = vpop.f32.mrb[11].mxu1  ;;  %v1009_v46 = vsel %vm4154_vm1, %v1005_v42, -1e+30 }
 0x3e1   : > { %v1014_v47 = vsel %vm1010_vm5, %v1009_v46, -inf }
 0x3e2   : > { %1015 = vmax.xlane.f32.xlu0 %v1014_v47 }
 0x467   : > { %v1013_v48 = vpop.xlane.xlu1 %1012 }
 0x468   : > { %v1017_v50 = vsub.f32 %v1008_v39, %v1013_v48 }
 0x46a   : > { %v1019_v51 = vmul.f32 1.442695, %v1017_v50 }
 0x46c   : > { %3342 = vpow2.f32 %v1019_v51 }
 0x46f   : > { %v1016_v52 = vpop.xlane.xlu0 %1015 }
 0x470   : > { %v1018_v53 = vsub.f32 %v1009_v46, %v1016_v52 }
 0x472   : > { %v1021_v54 = vmul.f32 1.442695, %v1018_v53 }
 0x474   : > { %3344 = vpow2.f32 %v1021_v54 }
 0x476   : > { %v3343_v56 = vpop.eup %3342 }
 0x477   : > { %v1023_v57 = vsel %vm1010_vm5, %v3343_v56, 0.0 }
 0x478   : > { %1024 = vadd.xlane.f32.xlu0 %v1023_v57 }
 0x47e   : > { %v3345_v58 = vpop.eup %3344 }
 0x47f   : > { %v1026_v59 = vsel %vm1010_vm5, %v3345_v58, 0.0 }
 0x480   : > { %1027 = vadd.xlane.f32.xlu1 %v1026_v59 }
 0x48e   : > { %1133 = vrot.lane.b32.xlu0 %v4174_v10, %s3708_s19 }
 0x491   : > { %1185 = vrot.lane.b32.xlu1 %v4189_v23, %s3708_s19 }
 0x492   : > { %1182 = vrot.lane.b32.xlu0 %v4202_v32, %s3708_s19 }
 0x495   : > { %1130 = vrot.lane.b32.xlu1 %v4187_v22, %s3708_s19 }
 0x505   : > { %v1025_v60 = vpop.xlane.xlu0 %1024 }
 0x506   : > { %3346 = vrcp.f32 %v1025_v60 }
 0x509   : > { %v1134_v61 = vpop.permute.xlu0 %1133 }
 0x50a   : > { %v1139_v62 = vsel %vm911_vm3, %v1134_v61, 0 }
 0x50b   : > { %3025 = vmatpush3.bf16.xpose.msra.mxu0 %v1139_v62 }
 0x50c   : > { %3036 = vmatprep.subr.bf16.mxu0 %v3703_v6 }
 0x50d   : > { %v1028_v63 = vpop.xlane.xlu1 %1027  ;;  %v1183_v12 = vpop.permute.xlu0 %1182 }
 0x50e   : > { %3348 = vrcp.f32 %v1028_v63 }
 0x510   : > { %v3347_v0 = vpop.eup %3346 }
 0x511   : > { %v1031_v2 = vmul.f32 %v3347_v0, %v3343_v56  ;;  %v1186_v3 = vpop.permute.xlu1 %1185  ;;  %v3266_v0 = vld [vmem:[%s4077_s3] sm:$0xff]  }
 0x512   : > { %v1191_v11 = vsel %vm911_vm3, %v1186_v3, 0  ;;  %v3267_v3 = vld [vmem:[%s4077_s3 + $0x8] sm:$0xff]  }
 0x513   : > { %v1033_v4 = vpack.c.bf16 %v1031_v2, %v1031_v2 }
 0x515   : > { %v1131_v5 = vpop.permute.xlu1 %1130  ;;  %3015 = vmatmul.mubr.msk.bf16.vlgmr.msra.gmra.mrb[12].mxu1 %vm1010_vm5, %v1033_v4 }
 0x516   : > { %3019 = vmatpush3.bf16.msra.mxu1 %v1086_v7  ;;  %3027 = vmatmul.mubr.msk.bf16.vlgmr.msra.gmra.mrb[4].mxu0 %vm911_vm3, %v1131_v5 }
 0x517   : > { %3020 = vmatprep.mubr.msk.bf16.mxu1 %vm3705_vm0, %v3703_v6  ;;  %3030 = vmatprep.subr.bf16.mxu1 %v3703_v6 }
 0x518   : > { %v3349_v8 = vpop.eup %3348  ;;  %3038 = vmatprep.mubr.msk.bf16.mxu0 %vm3705_vm0, %v3703_v6 }
 0x519   : > { %v1032_v55 = vmul.f32 %v3349_v8, %v3345_v58  ;;  %v3268_v8 = vld [vmem:[%s4077_s3 + $0x10] sm:$0xff]  }
 0x51b   : > { %v1034_v9 = vpack.c.bf16 %v1032_v55, %v1032_v55  ;;  %v3269_v55 = vld [vmem:[%s4077_s3 + $0x18] sm:$0xff]  }
 0x51d   : > { %3021 = vmatmul.mubr.msk.bf16.vlgmr.msra.gmra.mrb[16].mxu1 %vm1010_vm5, %v1034_v9 }
 0x51e   : > { %3032 = vmatprep.mubr.msk.bf16.mxu1 %vm3705_vm0, %v3703_v6 }
 0x51f   : > { %3031 = vmatpush3.bf16.xpose.msra.mxu1 %v1191_v11 }
 0x520   : > { %3042 = vmatprep.subr.bf16.mxu1 %v3703_v6 }
 0x526   : > { %3033 = vmatmul.mubr.msk.bf16.vlgmr.msra.gmra.mrb[20].mxu1 %vm911_vm3, %v1183_v12 }
 0x527   : > { %3044 = vmatprep.mubr.msk.bf16.mxu1 %vm3705_vm0, %v3703_v6 }
 0x5e8   : > { %v4250_v13 = vpop.f32.mrb[12].mxu1 }
 0x5e9   : > { %v3016_v14 = vpop.f32.mrb[13].mxu1  ;;  %v1175_v15 = vpop.f32.mrb[4].mxu0 }
 0x5ea   : > { %v1233_v16 = vmul.f32 0.17677669, %v1175_v15  ;;  %v1079_v17 = vpop.f32.mrb[14].mxu1  ;;  %v3028_v18 = vpop.f32.mrb[5].mxu0 }
 0x5eb   : > { %v3017_v19 = vpop.f32.mrb[15].mxu1  ;;  %v1178_v20 = vpop.f32.mrb[6].mxu0 }
 0x5ec   : > { %v3029_v21 = vpop.f32.mrb[7].mxu0  ;;  %v1235_v24 = vsel %vm4154_vm1, %v1233_v16, -1e+30 }
 0x5ed   : > { %v1237_v25 = vsel %vm1010_vm5, %v1235_v24, -inf }
 0x5ee   : > { %1238 = vmax.xlane.f32.xlu1 %v1237_v25 }
 0x5f0   : > { %v4255_v26 = vpop.f32.mrb[16].mxu1 }
 0x5f1   : > { %v1128_v27 = vpack.c.bf16 %v4255_v26, %v4250_v13  ;;  %v3022_v29 = vpop.f32.mrb[17].mxu1 }
 0x5f2   : > { %v1125_v31 = vpop.f32.mrb[18].mxu1 }
 0x5f3   : > { %v3023_v33 = vpop.f32.mrb[19].mxu1 }
 0x5f9   : > { %v1227_v34 = vpop.f32.mrb[20].mxu1 }
 0x5fa   : > { %v1234_v35 = vmul.f32 0.17677669, %v1227_v34  ;;  %v3034_v36 = vpop.f32.mrb[21].mxu1 }
 0x5fb   : > { %v1230_v37 = vpop.f32.mrb[22].mxu1 }
 0x5fc   : > { %v3035_v38 = vpop.f32.mrb[23].mxu1  ;;  %v1236_v39 = vsel %vm4154_vm1, %v1234_v35, -1e+30 }
 0x5fd   : > { %v1240_v40 = vsel %vm1010_vm5, %v1236_v39, -inf }
 0x5fe   : > { %1241 = vmax.xlane.f32.xlu0 %v1240_v40 }
 0x67b   : > { %v1239_v41 = vpop.xlane.xlu1 %1238 }
 0x67c   : > { %v1243_v42 = vsub.f32 %v1235_v24, %v1239_v41 }
 0x67e   : > { %v1245_v43 = vmul.f32 1.442695, %v1243_v42 }
 0x680   : > { %3350 = vpow2.f32 %v1245_v43 }
 0x68a   : > { %v3351_v44 = vpop.eup %3350 }
 0x68b   : > { %v1242_v45 = vpop.xlane.xlu0 %1241  ;;  %v1249_v46 = vsel %vm1010_vm5, %v3351_v44, 0.0 }
 0x68c   : > { %v1244_v47 = vsub.f32 %v1236_v39, %v1242_v45  ;;  %1250 = vadd.xlane.f32.xlu0 %v1249_v46 }
 0x68e   : > { %v1247_v48 = vmul.f32 1.442695, %v1244_v47 }
 0x690   : > { %3352 = vpow2.f32 %v1247_v48 }
 0x69a   : > { %v3353_v50 = vpop.eup %3352 }
 0x69b   : > { %v1252_v51 = vsel %vm1010_vm5, %v3353_v50, 0.0 }
 0x69c   : > { %1253 = vadd.xlane.f32.xlu1 %v1252_v51 }
 0x6a2   : > { %1262 = vrot.lane.b32.xlu0 %v4200_v30, %s3708_s19 }
 0x6a6   : > { %1524 = vrot.lane.b32.xlu0 %v4189_v23, %s3709_s9 }
 0x6aa   : > { %1522 = vrot.lane.b32.xlu0 %v4202_v32, %s3709_s9 }
 0x6ad   : > { %1311 = vrot.lane.b32.xlu1 %v4231_v1, %s3708_s19 }
 0x6b1   : > { %1474 = vrot.lane.b32.xlu1 %v4174_v10, %s3709_s9 }
 0x6b5   : > { %1472 = vrot.lane.b32.xlu1 %v4187_v22, %s3709_s9 }
 0x719   : > { %v1251_v52 = vpop.xlane.xlu0 %1250 }
 0x71a   : > { %3354 = vrcp.f32 %v1251_v52 }
 0x71d   : > { %v1263_v53 = vpop.permute.xlu0 %1262 }
 0x71e   : > { %v1268_v54 = vsel %vm1038_vm4, %v1263_v53, 0 }
 0x71f   : > { %3037 = vmatpush3.bf16.msra.mxu0 %v1268_v54 }
 0x720   : > { %3048 = vmatprep.subr.bf16.mxu0 %v3703_v6 }
 0x721   : > { %v1525_v4 = vpop.permute.xlu0 %1524 }
 0x722   : > { %v1530_v5 = vsel %vm911_vm3, %v1525_v4, 0 }
 0x724   : > { %v3355_v56 = vpop.eup %3354 }
 0x725   : > { %v1257_v57 = vmul.f32 %v3355_v56, %v3351_v44  ;;  %v1523_v7 = vpop.permute.xlu0 %1522 }
 0x727   : > { %v1259_v58 = vpack.c.bf16 %v1257_v57, %v1257_v57 }
 0x729   : > { %v1254_v59 = vpop.xlane.xlu1 %1253  ;;  %3039 = vmatmul.mubr.msk.bf16.vlgmr.msra.gmra.mrb[8].mxu0 %vm1010_vm5, %v1259_v58 }
 0x72a   : > { %3356 = vrcp.f32 %v1254_v59  ;;  %3052 = vmatprep.mubr.msk.bf16.mxu0 %vm3705_vm0, %v3703_v6  ;;  %3049 = vmatpush3.bf16.msra.mxu0 %v3268_v8 }
 0x72b   : > { %3050 = vmatprep.subr.bf16.mxu0 %v3703_v6 }
 0x72d   : > { %v1312_v60 = vpop.permute.xlu1 %1311 }
 0x72e   : > { %v1317_v61 = vsel %vm1038_vm4, %v1312_v60, 0  ;;  %3051 = vmatpush3.bf16.msra.mxu0 %v3269_v55 }
 0x72f   : > { %3043 = vmatpush3.bf16.msra.mxu1 %v1317_v61  ;;  %3064 = vmatprep.subr.bf16.mxu0 %v3703_v6 }
 0x730   : > { %3056 = vmatprep.subr.bf16.mxu1 %v3703_v6 }
 0x731   : > { %v1475_v14 = vpop.permute.xlu1 %1474 }
 0x732   : > { %v1480_v19 = vsel %vm911_vm3, %v1475_v14, 0 }
 0x734   : > { %v3357_v62 = vpop.eup %3356 }
 0x735   : > { %v1258_v63 = vmul.f32 %v3357_v62, %v3353_v50  ;;  %v1473_v25 = vpop.permute.xlu1 %1472 }
 0x737   : > { %v1260_v2 = vpack.c.bf16 %v1258_v63, %v1258_v63 }
 0x739   : > { %3045 = vmatmul.mubr.msk.bf16.vlgmr.msra.gmra.mrb[24].mxu1 %vm1010_vm5, %v1260_v2 }
 0x73a   : > { %3057 = vmatpush3.bf16.msra.mxu1 %v3266_v0  ;;  %3060 = vmatprep.mubr.msk.bf16.mxu1 %vm3705_vm0, %v3703_v6 }
 0x73b   : > { %3058 = vmatprep.subr.bf16.mxu1 %v3703_v6 }
 0x73e   : > { %3059 = vmatpush3.bf16.msra.mxu1 %v3267_v3 }
 0x73f   : > { %3070 = vmatprep.subr.bf16.mxu1 %v3703_v6 }
 0x741   : > { %3061 = vmatmul.mubr.msk.bf16.vlgmr.msra.gmra.mrb[28].mxu1 %vm911_vm3, %v1128_v27 }
 0x742   : > { %3072 = vmatprep.mubr.msk.bf16.mxu1 %vm3705_vm0, %v3703_v6 }
 0x747   : > { %3071 = vmatpush3.bf16.xpose.msra.mxu1 %v1530_v5 }
 0x748   : > { %3082 = vmatprep.subr.bf16.mxu1 %v3703_v6 }
 0x74e   : > { %3073 = vmatmul.mubr.msk.bf16.vlgmr.msra.gmra.mrb[32].mxu1 %vm911_vm3, %v1523_v7 }
 0x74f   : > { %3084 = vmatprep.mubr.msk.bf16.mxu1 %vm3705_vm0, %v3703_v6 }
 0x7fc   : > { %v1304_v9 = vpop.f32.mrb[8].mxu0 }
 0x7fd   : > { %v3040_v11 = vpop.f32.mrb[9].mxu0 }
 0x7fe   : > { %v1307_v12 = vpop.f32.mrb[10].mxu0 }
 0x7ff   : > { %v3041_v13 = vpop.f32.mrb[11].mxu0 }
 0x800   : > { %v3270_v13 = vld [vmem:[%s4077_s3 + $0x20] sm:$0xff]  }
 0x80c   : > { %v1353_v15 = vpop.f32.mrb[24].mxu1 }
 0x80d   : > { %v1359_v16 = vpack.c.bf16 %v1353_v15, %v1304_v9  ;;  %v3046_v17 = vpop.f32.mrb[25].mxu1  ;;  %v3271_v15 = vld [vmem:[%s4077_s3 + $0x28] sm:$0xff]  }
 0x80e   : > { %v1356_v18 = vpop.f32.mrb[26].mxu1 }
 0x80f   : > { %v3047_v20 = vpop.f32.mrb[27].mxu1  ;;  %3053 = vmatmul.mubr.msk.bf16.vlgmr.msra.gmra.mrb[12].mxu0 %vm911_vm3, %v1359_v16 }
 0x810   : > { %3065 = vmatpush3.bf16.xpose.msra.mxu0 %v1480_v19  ;;  %3066 = vmatprep.mubr.msk.bf16.mxu0 %vm3705_vm0, %v3703_v6 }
 0x811   : > { %3076 = vmatprep.subr.bf16.mxu0 %v3703_v6 }
 0x814   : > { %v1465_v21 = vpop.f32.mrb[28].mxu1 }
 0x815   : > { %v3062_v24 = vpop.f32.mrb[29].mxu1 }
 0x816   : > { %v1468_v26 = vpop.f32.mrb[30].mxu1 }
 0x817   : > { %v3063_v27 = vpop.f32.mrb[31].mxu1  ;;  %3067 = vmatmul.mubr.msk.bf16.vlgmr.msra.gmra.mrb[16].mxu0 %vm911_vm3, %v1473_v25 }
 0x818   : > { %3078 = vmatprep.mubr.msk.bf16.mxu0 %vm3705_vm0, %v3703_v6 }
 0x821   : > { %v1566_v29 = vpop.f32.mrb[32].mxu1 }
 0x822   : > { %v1573_v31 = vmul.f32 0.17677669, %v1566_v29  ;;  %v3074_v33 = vpop.f32.mrb[33].mxu1 }
 0x823   : > { %v1569_v34 = vpop.f32.mrb[34].mxu1 }
 0x824   : > { %v3075_v35 = vpop.f32.mrb[35].mxu1  ;;  %v1575_v36 = vsel %vm4154_vm1, %v1573_v31, -1e+30 }
 0x825   : > { %v1579_v37 = vsel %vm1010_vm5, %v1575_v36, -inf }
 0x826   : > { %1580 = vmax.xlane.f32.xlu0 %v1579_v37 }
 0x8b3   : > { %v1581_v38 = vpop.xlane.xlu0 %1580 }
 0x8b4   : > { %v1583_v39 = vsub.f32 %v1575_v36, %v1581_v38 }
 0x8b6   : > { %v1586_v40 = vmul.f32 1.442695, %v1583_v39 }
 0x8b8   : > { %3358 = vpow2.f32 %v1586_v40 }
 0x8c2   : > { %v3359_v56 = vpop.eup %3358 }
 0x8c3   : > { %v1591_v57 = vsel %vm1010_vm5, %v3359_v56, 0.0 }
 0x8e2   : > { %v1409_v41 = vpop.f32.mrb[12].mxu0 }
 0x8e3   : > { %v4313_v42 = vadd.f32 %v1465_v21, %v1409_v41  ;;  %v3054_v43 = vpop.f32.mrb[13].mxu0 }
 0x8e4   : > { %v1412_v44 = vpop.f32.mrb[14].mxu0 }
 0x8e5   : > { %v4315_v45 = vadd.f32 %v1468_v26, %v1412_v44  ;;  %v3055_v46 = vpop.f32.mrb[15].mxu0 }
 0x8ea   : > { %v1516_v47 = vpop.f32.mrb[16].mxu0 }
 0x8eb   : > { %v1572_v48 = vmul.f32 0.17677669, %v1516_v47  ;;  %v3068_v50 = vpop.f32.mrb[17].mxu0 }
 0x8ec   : > { %v1519_v51 = vpop.f32.mrb[18].mxu0 }
 0x8ed   : > { %v3069_v52 = vpop.f32.mrb[19].mxu0  ;;  %v1574_v53 = vsel %vm4154_vm1, %v1572_v48, -1e+30 }
 0x8ee   : > { %v1576_v54 = vsel %vm1010_vm5, %v1574_v53, -inf }
 0x8ef   : > { %1577 = vmax.xlane.f32.xlu1 %v1576_v54 }
 0x8f3   : > { %1592 = vadd.xlane.f32.xlu1 %v1591_v57 }
 0x904   : > { %1648 = vrot.lane.b32.xlu1 %v4231_v1, %s3709_s9 }
 0x908   : > { %1757 = vrot.lane.b32.xlu1 %v4174_v10, %s3710_s28 }
 0x90c   : > { %1755 = vrot.lane.b32.xlu1 %v4187_v22, %s3710_s28 }
 0x97c   : > { %v1578_v58 = vpop.xlane.xlu1 %1577 }
 0x97d   : > { %v1582_v59 = vsub.f32 %v1574_v53, %v1578_v58 }
 0x97f   : > { %v1584_v60 = vmul.f32 1.442695, %v1582_v59 }
 0x980   : > { %v1593_v61 = vpop.xlane.xlu1 %1592 }
 0x981   : > { %3360 = vpow2.f32 %v1584_v60 }
 0x982   : > { %3362 = vrcp.f32 %v1593_v61 }
 0x984   : > { %v1649_v62 = vpop.permute.xlu1 %1648 }
 0x985   : > { %v1654_v63 = vsel %vm1038_vm4, %v1649_v62, 0 }
 0x986   : > { %3083 = vmatpush3.bf16.msra.mxu1 %v1654_v63 }
 0x987   : > { %3096 = vmatprep.subr.bf16.mxu1 %v3703_v6 }
 0x988   : > { %v1758_v4 = vpop.permute.xlu1 %1757 }
 0x989   : > { %v1763_v5 = vsel %vm911_vm3, %v1758_v4, 0 }
 0x98b   : > { %v3361_v0 = vpop.eup %3360 }
 0x98c   : > { %v3363_v2 = vpop.eup %3362  ;;  %v1588_v3 = vsel %vm1010_vm5, %v3361_v0, 0.0  ;;  %v1756_v7 = vpop.permute.xlu1 %1755 }
 0x98d   : > { %v1597_v10 = vmul.f32 %v3363_v2, %v3359_v56  ;;  %1589 = vadd.xlane.f32.xlu0 %v1588_v3 }
 0x98f   : > { %v1599_v22 = vpack.c.bf16 %v1597_v10, %v1597_v10  ;;  %v3272_v10 = vld [vmem:[%s4077_s3 + $0x30] sm:$0xff]  }
 0x991   : > { %3085 = vmatmul.mubr.msk.bf16.vlgmr.msra.gmra.mrb[36].mxu1 %vm1010_vm5, %v1599_v22 }
 0x992   : > { %3097 = vmatpush3.bf16.xpose.msra.mxu1 %v1763_v5  ;;  %3098 = vmatprep.mubr.msk.bf16.mxu1 %vm3705_vm0, %v3703_v6 }
 0x993   : > { %3108 = vmatprep.subr.bf16.mxu1 %v3703_v6 }
 0x999   : > { %3099 = vmatmul.mubr.msk.bf16.vlgmr.msra.gmra.mrb[40].mxu1 %vm911_vm3, %v1756_v7 }
 0x99a   : > { %3110 = vmatprep.mubr.msk.bf16.mxu1 %vm3705_vm0, %v3703_v6 }
 0x9a3   : > { %1600 = vrot.lane.b32.xlu0 %v4200_v30, %s3709_s9 }
 0x9a7   : > { %1807 = vrot.lane.b32.xlu0 %v4189_v23, %s3710_s28 }
 0x9ab   : > { %1805 = vrot.lane.b32.xlu0 %v4202_v32, %s3710_s28 }
 0xa1a   : > { %v1590_v8 = vpop.xlane.xlu0 %1589 }
 0xa1b   : > { %3364 = vrcp.f32 %v1590_v8 }
 0xa1e   : > { %v1601_v55 = vpop.permute.xlu0 %1600 }
 0xa1f   : > { %v1606_v9 = vsel %vm1038_vm4, %v1601_v55, 0 }
 0xa20   : > { %3077 = vmatpush3.bf16.msra.mxu0 %v1606_v9 }
 0xa21   : > { %3088 = vmatprep.subr.bf16.mxu0 %v3703_v6 }
 0xa22   : > { %v1808_v27 = vpop.permute.xlu0 %1807 }
 0xa23   : > { %v1813_v35 = vsel %vm911_vm3, %v1808_v27, 0  ;;  %v3291_v27 = vld [vmem:[%s4079_s4 + $0x4c] ss:$16 sps:$4 sm:$0xff]  }
 0xa25   : > { %v3365_v11 = vpop.eup %3364 }
 0xa26   : > { %v1596_v12 = vmul.f32 %v3365_v11, %v3361_v0  ;;  %v1806_v37 = vpop.permute.xlu0 %1805 }
 0xa28   : > { %v1598_v14 = vpack.c.bf16 %v1596_v12, %v1596_v12  ;;  %v3273_v12 = vld [vmem:[%s4077_s3 + $0x38] sm:$0xff]  }
 0xa2a   : > { %3079 = vmatmul.mubr.msk.bf16.vlgmr.msra.gmra.mrb[20].mxu0 %vm1010_vm5, %v1598_v14 }
 0xa2b   : > { %3089 = vmatpush3.bf16.msra.mxu0 %v3270_v13  ;;  %3092 = vmatprep.mubr.msk.bf16.mxu0 %vm3705_vm0, %v3703_v6 }
 0xa2c   : > { %3090 = vmatprep.subr.bf16.mxu0 %v3703_v6 }
 0xa2f   : > { %3091 = vmatpush3.bf16.msra.mxu0 %v3271_v15 }
 0xa30   : > { %3102 = vmatprep.subr.bf16.mxu0 %v3703_v6 }
 0xa64   : > { %v1690_v23 = vpop.f32.mrb[36].mxu1 }
 0xa65   : > { %v3086_v32 = vpop.f32.mrb[37].mxu1 }
 0xa66   : > { %v1693_v16 = vpop.f32.mrb[38].mxu1 }
 0xa67   : > { %v3087_v17 = vpop.f32.mrb[39].mxu1  ;;  %v3274_v16 = vld [vmem:[%s4079_s4] ss:$16 sps:$4 sm:$0xff]  }
 0xa68   : > { %v3276_v17 = vld [vmem:[%s4079_s4 + $0x4] ss:$16 sps:$4 sm:$0xff]  }
 0xa6c   : > { %v1799_v18 = vpop.f32.mrb[40].mxu1 }
 0xa6d   : > { %v1855_v19 = vmul.f32 0.17677669, %v1799_v18  ;;  %v3100_v20 = vpop.f32.mrb[41].mxu1  ;;  %v3277_v18 = vld [vmem:[%s4079_s4 + $0x8] ss:$16 sps:$4 sm:$0xff]  }
 0xa6e   : > { %v1802_v21 = vpop.f32.mrb[42].mxu1  ;;  %v3282_v20 = vld [vmem:[%s4079_s4 + $0x24] ss:$16 sps:$4 sm:$0xff]  }
 0xa6f   : > { %v3101_v24 = vpop.f32.mrb[43].mxu1  ;;  %v1857_v25 = vsel %vm4154_vm1, %v1855_v19, -1e+30  ;;  %v3279_v19 = vld [vmem:[%s4079_s4 + $0xc] ss:$16 sps:$4 sm:$0xff]  }
 0xa70   : > { %v1859_v26 = vsel %vm1010_vm5, %v1857_v25, -inf  ;;  %v3285_v21 = vld [vmem:[%s4079_s4 + $0x2c] ss:$16 sps:$4 sm:$0xff]   ;;  %v3280_v24 = vld [vmem:[%s4079_s4 + $0x20] ss:$16 sps:$4 sm:$0xff]  }
 0xa71   : > { %1860 = vmax.xlane.f32.xlu1 %v1859_v26  ;;  %v3288_v26 = vld [vmem:[%s4079_s4 + $0x44] ss:$16 sps:$4 sm:$0xff]  }
 0xafd   : > { %v1642_v29 = vpop.f32.mrb[20].mxu0 }
 0xafe   : > { %v1696_v31 = vpack.c.bf16 %v1690_v23, %v1642_v29  ;;  %v3080_v33 = vpop.f32.mrb[21].mxu0  ;;  %v1861_v38 = vpop.xlane.xlu1 %1860  ;;  %v3289_v29 = vld [vmem:[%s4079_s4 + $0x48] ss:$16 sps:$4 sm:$0xff]  }
 0xaff   : > { %v1645_v34 = vpop.f32.mrb[22].mxu0  ;;  %v1865_v39 = vsub.f32 %v1857_v25, %v1861_v38  ;;  %v3283_v25 = vld [vmem:[%s4079_s4 + $0x28] ss:$16 sps:$4 sm:$0xff]  }
 0xb00   : > { %v3081_v36 = vpop.f32.mrb[23].mxu0  ;;  %3093 = vmatmul.mubr.msk.bf16.vlgmr.msra.gmra.mrb[24].mxu0 %vm911_vm3, %v1696_v31 }
 0xb01   : > { %3103 = vmatpush3.bf16.xpose.msra.mxu0 %v1813_v35  ;;  %3104 = vmatprep.mubr.msk.bf16.mxu0 %vm3705_vm0, %v3703_v6  ;;  %v1867_v40 = vmul.f32 1.442695, %v1865_v39  ;;  %v3394_v36 = vld [vmem:[#allocation2] sm:$0xff] }
 0xb02   : > { %3114 = vmatprep.subr.bf16.mxu0 %v3703_v6 }
 0xb03   : > { %3366 = vpow2.f32 %v1867_v40  ;;  %v3395_v40 = vld [vmem:[#allocation2 + $0x8] sm:$0xff] }
 0xb08   : > { %3105 = vmatmul.mubr.msk.bf16.vlgmr.msra.gmra.mrb[28].mxu0 %vm911_vm3, %v1806_v37 }
 0xb09   : > { %3116 = vmatprep.mubr.msk.bf16.mxu0 %vm3705_vm0, %v3703_v6 }
 0xb0d   : > { %v3367_v58 = vpop.eup %3366 }
 0xbd3   : > { %v1746_v41 = vpop.f32.mrb[24].mxu0 }
 0xbd4   : > { %v4365_v43 = vadd.f32 %v1746_v41, %v4313_v42  ;;  %v3094_v44 = vpop.f32.mrb[25].mxu0  ;;  %v1871_v42 = vsel %vm1010_vm5, %v3367_v58, 0.0 }
 0xbd5   : > { %v1749_v46 = vpop.f32.mrb[26].mxu0 }
 0xbd6   : > { %v4368_v47 = vadd.f32 %v1749_v46, %v4315_v45  ;;  %v3095_v48 = vpop.f32.mrb[27].mxu0  ;;  %v3294_v46 = vld [vmem:[%s4079_s4 + $0x64] ss:$16 sps:$4 sm:$0xff]  }
 0xbd7   : > { %v3292_v48 = vld [vmem:[%s4079_s4 + $0x60] ss:$16 sps:$4 sm:$0xff]  }
 0xbdb   : > { %v1849_v50 = vpop.f32.mrb[28].mxu0 }
 0xbdc   : > { %v1856_v51 = vmul.f32 0.17677669, %v1849_v50  ;;  %v3106_v52 = vpop.f32.mrb[29].mxu0  ;;  %v3295_v50 = vld [vmem:[%s4079_s4 + $0x68] ss:$16 sps:$4 sm:$0xff]  }
 0xbdd   : > { %v1852_v53 = vpop.f32.mrb[30].mxu0  ;;  %v3300_v52 = vld [vmem:[%s4079_s4 + $0x84] ss:$16 sps:$4 sm:$0xff]  }
 0xbde   : > { %v3107_v54 = vpop.f32.mrb[31].mxu0  ;;  %v1858_v56 = vsel %vm4154_vm1, %v1856_v51, -1e+30  ;;  %v3298_v51 = vld [vmem:[%s4079_s4 + $0x80] ss:$16 sps:$4 sm:$0xff]  }
 0xbdf   : > { %v1862_v57 = vsel %vm1010_vm5, %v1858_v56, -inf  ;;  %v3301_v53 = vld [vmem:[%s4079_s4 + $0x88] ss:$16 sps:$4 sm:$0xff]   ;;  %v3303_v54 = vld [vmem:[%s4079_s4 + $0x8c] ss:$16 sps:$4 sm:$0xff]  }
 0xbe0   : > { %1863 = vmax.xlane.f32.xlu0 %v1862_v57  ;;  %v3309_v57 = vld [vmem:[%s4079_s4 + $0xac] ss:$16 sps:$4 sm:$0xff]  }
 0xbe4   : > { %1872 = vadd.xlane.f32.xlu0 %v1871_v42  ;;  %v3307_v42 = vld [vmem:[%s4079_s4 + $0xa8] ss:$16 sps:$4 sm:$0xff]  }
 0xbfa   : > { %1883 = vrot.lane.b32.xlu0 %v4200_v30, %s3710_s28 }
 0xc6d   : > { %v1864_v45 = vpop.xlane.xlu0 %1863 }
 0xc6e   : > { %v1866_v59 = vsub.f32 %v1858_v56, %v1864_v45  ;;  %v3306_v56 = vld [vmem:[%s4079_s4 + $0xa4] ss:$16 sps:$4 sm:$0xff]  }
 0xc6f   : > { %v3312_v45 = vld [vmem:[%s4079_s4 + $0xc4] ss:$16 sps:$4 sm:$0xff]  }
 0xc70   : > { %v1869_v60 = vmul.f32 1.442695, %v1866_v59  ;;  %v3315_v59 = vld [vmem:[%s4079_s4 + $0xcc] ss:$16 sps:$4 sm:$0xff]  }
 0xc71   : > { %v1873_v61 = vpop.xlane.xlu0 %1872 }
 0xc72   : > { %3368 = vpow2.f32 %v1869_v60  ;;  %v3310_v60 = vld [vmem:[%s4079_s4 + $0xc0] ss:$16 sps:$4 sm:$0xff]  }
 0xc73   : > { %3370 = vrcp.f32 %v1873_v61  ;;  %v3313_v61 = vld [vmem:[%s4079_s4 + $0xc8] ss:$16 sps:$4 sm:$0xff]  }
 0xc75   : > { %v1884_v62 = vpop.permute.xlu0 %1883 }
 0xc76   : > { %v1889_v49 = vsel %vm1038_vm4, %v1884_v62, 0  ;;  %v3318_v62 = vld [vmem:[%s4079_s4 + $0xe4] ss:$16 sps:$4 sm:$0xff]  }
 0xc77   : > { %3109 = vmatpush3.bf16.msra.mxu1 %v1889_v49  ;;  %v3321_v49 = vld [vmem:[%s4079_s4 + $0xec] ss:$16 sps:$4 sm:$0xff]  }
 0xc78   : > { %3120 = vmatprep.subr.bf16.mxu1 %v3703_v6 }
 0xc7c   : > { %v3369_v63 = vpop.eup %3368 }
 0xc7d   : > { %v3371_v0 = vpop.eup %3370  ;;  %v1874_v2 = vsel %vm1010_vm5, %v3369_v63, 0.0 }
 0xc7e   : > { %v1879_v3 = vmul.f32 %v3371_v0, %v3367_v58  ;;  %1875 = vadd.xlane.f32.xlu1 %v1874_v2  ;;  %v3304_v58 = vld [vmem:[%s4079_s4 + $0xa0] ss:$16 sps:$4 sm:$0xff]   ;;  %v3319_v0 = vld [vmem:[%s4079_s4 + $0xe8] ss:$16 sps:$4 sm:$0xff]  }
 0xc80   : > { %v1881_v30 = vpack.c.bf16 %v1879_v3, %v1879_v3 }
 0xc82   : > { %3111 = vmatmul.mubr.msk.bf16.vlgmr.msra.gmra.mrb[44].mxu1 %vm1010_vm5, %v1881_v30 }
 0xc83   : > { %3124 = vmatprep.mubr.msk.bf16.mxu1 %vm3705_vm0, %v3703_v6  ;;  %3121 = vmatpush3.bf16.msra.mxu1 %v3272_v10 }
 0xc84   : > { %3122 = vmatprep.subr.bf16.mxu1 %v3703_v6 }
 0xc87   : > { %3123 = vmatpush3.bf16.msra.mxu1 %v3273_v12  ;;  %v3322_v12 = vld [vmem:[%s4094_s25 + $0x40] sm:$0xff]  }
 0xc88   : > { %2299 = vmatprep.subr.bf16.mxu1 %v3279_v19  ;;  %v3331_v19 = vld [vmem:[%s4094_s25 + $0x20] sm:$0xff]  }
 0xc8f   : > { %1931 = vrot.lane.b32.xlu1 %v4231_v1, %s3710_s28 }
 0xd0b   : > { %v1876_v4 = vpop.xlane.xlu1 %1875 }
 0xd0c   : > { %3372 = vrcp.f32 %v1876_v4 }
 0xd0f   : > { %v1932_v22 = vpop.permute.xlu1 %1931 }
 0xd10   : > { %v1937_v5 = vsel %vm1038_vm4, %v1932_v22, 0 }
 0xd11   : > { %3115 = vmatpush3.bf16.msra.mxu0 %v1937_v5 }
 0xd12   : > { %2256 = vmatprep.subr.bf16.mxu0 %v3276_v17  ;;  %v3329_v17 = vld [vmem:[%s4094_s25 + $0x18] sm:$0xff]  }
 0xd16   : > { %v3373_v7 = vpop.eup %3372 }
 0xd17   : > { %v1880_v8 = vmul.f32 %v3373_v7, %v3369_v63  ;;  %v3316_v63 = vld [vmem:[%s4079_s4 + $0xe0] ss:$16 sps:$4 sm:$0xff]  }
 0xd19   : > { %v1882_v55 = vpack.c.bf16 %v1880_v8, %v1880_v8 }
 0xd1b   : > { %3117 = vmatmul.mubr.msk.bf16.vlgmr.msra.gmra.mrb[32].mxu0 %vm1010_vm5, %v1882_v55  ;;  %v2843_v55 = vld [vmem:[%s458_s15] ss:$0 sm:$0xff] }
 0xd1c   : > { %2288 = vmatprep.mubr.bf16.mxu0 %v3704_v28  ;;  %2257 = vmatpush1.bf16.msra.mxu0 %v3274_v16  ;;  %v3328_v16 = vld [vmem:[%s4094_s25 + $0x58] sm:$0xff]  }
 0xd1d   : > { %2258 = vmatprep.subr.bf16.mxu0 %v3282_v20  ;;  %v3332_v20 = vld [vmem:[%s4094_s25 + $0x68] sm:$0xff]  }
 0xd20   : > { %2259 = vmatpush1.bf16.msra.mxu0 %v3280_v24  ;;  %v3334_v24 = vld [vmem:[%s4094_s25 + $0x70] sm:$0xff]  }
 0xd21   : > { %2260 = vmatprep.subr.bf16.mxu0 %v3288_v26  ;;  %v3336_v26 = vld [vmem:[%s4094_s25 + $0x78] sm:$0xff]  }
 0xd55   : > { %v1925_v1 = vpop.f32.mrb[44].mxu1 }
 0xd56   : > { %v3112_v9 = vpop.f32.mrb[45].mxu1 }
 0xd57   : > { %v1928_v6 = vpop.f32.mrb[46].mxu1 }
 0xd58   : > { %v3113_v11 = vpop.f32.mrb[47].mxu1 }
 0xdee   : > { %v1973_v13 = vpop.f32.mrb[32].mxu0 }
 0xdef   : > { %v1979_v14 = vpack.c.bf16 %v1973_v13, %v1925_v1  ;;  %v3118_v15 = vpop.f32.mrb[33].mxu0  ;;  %v3323_v13 = vld [vmem:[%s4094_s25] sm:$0xff]  }
 0xdf0   : > { %v1976_v23 = vpop.f32.mrb[34].mxu0  ;;  %v3325_v15 = vld [vmem:[%s4094_s25 + $0x8] sm:$0xff]  }
 0xdf1   : > { %v3119_v32 = vpop.f32.mrb[35].mxu0  ;;  %3125 = vmatmul.mubr.msk.bf16.vlgmr.msra.gmra.mrb[48].mxu1 %vm911_vm3, %v1979_v14  ;;  %v3324_v14 = vld [vmem:[%s4094_s25 + $0x48] sm:$0xff]   ;;  %v3326_v23 = vld [vmem:[%s4094_s25 + $0x50] sm:$0xff]  }
 0xdf2   : > { %2331 = vmatprep.mubr.bf16.mxu1 %v3704_v28  ;;  %2300 = vmatpush1.bf16.msra.mxu1 %v3277_v18  ;;  %v3286_v28 = vld [vmem:[%s4079_s4 + $0x40] ss:$16 sps:$4 sm:$0xff]  }
 0xdf3   : > { %2301 = vmatprep.subr.bf16.mxu1 %v3285_v21  ;;  %2261 = vmatpush1.bf16.msra.mxu0 %v3286_v28  ;;  %v3327_v32 = vld [vmem:[%s4094_s25 + $0x10] sm:$0xff]   ;;  %v3330_v18 = vld [vmem:[%s4094_s25 + $0x60] sm:$0xff]   ;;  %v3333_v21 = vld [vmem:[%s4094_s25 + $0x28] sm:$0xff]  }
 0xdf4   : > { %2262 = vmatprep.subr.bf16.mxu0 %v3294_v46 }
 0xdf6   : > { %2302 = vmatpush1.bf16.msra.mxu1 %v3283_v25  ;;  %v3335_v25 = vld [vmem:[%s4094_s25 + $0x30] sm:$0xff]  }
 0xdf7   : > { %2303 = vmatprep.subr.bf16.mxu1 %v3291_v27  ;;  %2263 = vmatpush1.bf16.msra.mxu0 %v3292_v48  ;;  %v3337_v27 = vld [vmem:[%s4094_s25 + $0x38] sm:$0xff]  }
 0xdf8   : > { %2264 = vmatprep.subr.bf16.mxu0 %v3300_v52 }
 0xdfa   : > { %2304 = vmatpush1.bf16.msra.mxu1 %v3289_v29 }
 0xdfb   : > { %2265 = vmatpush1.bf16.msra.mxu0 %v3298_v51 }
 0xdfc   : > { %2266 = vmatprep.subr.bf16.mxu0 %v3306_v56 }
 0xdff   : > { %2267 = vmatpush1.bf16.msra.mxu0 %v3304_v58 }
 0xe00   : > { %2268 = vmatprep.subr.bf16.mxu0 %v3312_v45 }
 0xe03   : > { %2269 = vmatpush1.bf16.msra.mxu0 %v3310_v60 }
 0xe04   : > { %2270 = vmatprep.subr.bf16.mxu0 %v3318_v62 }
 0xe07   : > { %2271 = vmatpush1.bf16.msra.mxu0 %v3316_v63 }
 0xe08   : > { %2958 = vmatprep.subr.bf16.mxu0 %v3322_v12 }
 0xec4   : > { %v2029_v31 = vpop.f32.mrb[48].mxu1 }
 0xec5   : > { %v2036_v33 = vadd.f32 %v2029_v31, %v4365_v43  ;;  %v3126_v34 = vpop.f32.mrb[49].mxu1 }
 0xec6   : > { %v2032_v35 = vpop.f32.mrb[50].mxu1 }
 0xec7   : > { %v4405_v37 = vadd.f32 %v3394_v36, %v2036_v33  ;;  %v2037_v38 = vadd.f32 %v2032_v35, %v4368_v47  ;;  %v3127_v39 = vpop.f32.mrb[51].mxu1  ;;  %v3297_v47 = vld [vmem:[%s4079_s4 + $0x6c] ss:$16 sps:$4 sm:$0xff]  }
 0xec8   : > { %2305 = vmatprep.subr.bf16.mxu1 %v3297_v47 }
 0xec9   : > { %v4408_v41 = vadd.f32 %v3395_v40, %v2037_v38  ;;  %v2041_v44 = vmul.f32 %v4405_v37, %v4405_v37  ;;  %2306 = vmatpush1.bf16.msra.mxu1 %v3295_v50 }
 0xeca   : > { %2307 = vmatprep.subr.bf16.mxu1 %v3303_v54 }
 0xecb   : > { %2043 = vadd.xlane.f32.xlu1 %v2041_v44  ;;  %v2042_v43 = vmul.f32 %v4408_v41, %v4408_v41 }
 0xecd   : > { %2045 = vadd.xlane.f32.xlu0 %v2042_v43  ;;  %2308 = vmatpush1.bf16.msra.mxu1 %v3301_v53 }
 0xece   : > { %2309 = vmatprep.subr.bf16.mxu1 %v3309_v57 }
 0xed1   : > { %2310 = vmatpush1.bf16.msra.mxu1 %v3307_v42 }
 0xed2   : > { %2311 = vmatprep.subr.bf16.mxu1 %v3315_v59 }
 0xed5   : > { %2312 = vmatpush1.bf16.msra.mxu1 %v3313_v61 }
 0xed6   : > { %2313 = vmatprep.subr.bf16.mxu1 %v3321_v49 }
 0xed9   : > { %2314 = vmatpush1.bf16.msra.mxu1 %v3319_v0 }
 0xf58   : > { %v2044_v2 = vpop.xlane.xlu1 %2043 }
 0xf59   : > { %v2047_v3 = vmul.f32 0.0078125, %v2044_v2 }
 0xf5a   : > { %v2046_v30 = vpop.xlane.xlu0 %2045 }
 0xf5b   : > { %v2049_v10 = vadd.f32 1e-06, %v2047_v3  ;;  %v2048_v4 = vmul.f32 0.0078125, %v2046_v30 }
 0xf5d   : > { %3374 = vrsqrt.f32 %v2049_v10  ;;  %v2050_v22 = vadd.f32 1e-06, %v2048_v4 }
 0xf5f   : > { %3376 = vrsqrt.f32 %v2050_v22 }
 0xf67   : > { %v3375_v5 = vpop.eup %3374 }
 0xf68   : > { %v2053_v7 = vmul.f32 %v3375_v5, %v4405_v37 }
 0xf69   : > { %v3377_v8 = vpop.eup %3376 }
 0xf6a   : > { %v2054_v1 = vmul.f32 %v3377_v8, %v4408_v41  ;;  %v2061_v9 = vmul.f32 %v2843_v55, %v2053_v7 }
 0xf6c   : > { %v2062_v6 = vmul.f32 %v2843_v55, %v2054_v1 }
 0xf6e   : > { %v2063_v11 = vpack.c.bf16 %v2062_v6, %v2061_v9 }
 0xf70   : > { %2289 = vmatmul.mubr.bf16.vlgmr.msra.gmra.mrb[36].mxu0 %v2063_v11  ;;  %2332 = vmatmul.mubr.bf16.vlgmr.msra.gmra.mrb[52].mxu1 %v2063_v11 }
 0xf71   : > { %2959 = vmatpush3.bf16.msra.mxu0 %v3323_v13 }
 0xf72   : > { %2960 = vmatprep.subr.bf16.mxu0 %v3324_v14 }
 0xf75   : > { %2961 = vmatpush3.bf16.msra.mxu0 %v3325_v15 }
 0xf76   : > { %2962 = vmatprep.subr.bf16.mxu0 %v3326_v23 }
 0xf79   : > { %2963 = vmatpush3.bf16.msra.mxu0 %v3327_v32 }
 0xf7a   : > { %2964 = vmatprep.subr.bf16.mxu0 %v3328_v16 }
 0xf7d   : > { %2965 = vmatpush3.bf16.msra.mxu0 %v3329_v17  ;;  %v2897_v17 = vld [vmem:[#allocation8] ss:$0 sm:$0xff] (!%p2896_p3) }
 0xf7e   : > { %2966 = vmatprep.subr.bf16.mxu0 %v3330_v18 }
 0xf81   : > { %2967 = vmatpush3.bf16.msra.mxu0 %v3331_v19 }
 0xf82   : > { %2968 = vmatprep.subr.bf16.mxu0 %v3332_v20 }
 0xf85   : > { %2969 = vmatpush3.bf16.msra.mxu0 %v3333_v21 }
 0xf86   : > { %2970 = vmatprep.subr.bf16.mxu0 %v3334_v24 }
 0xf89   : > { %2971 = vmatpush3.bf16.msra.mxu0 %v3335_v25 }
 0xf8a   : > { %2972 = vmatprep.subr.bf16.mxu0 %v3336_v26 }
 0xf8d   : > { %2973 = vmatpush3.bf16.msra.mxu0 %v3337_v27 }
0x1043   : > { %v2290_v28 = vpop.f32.mrb[36].mxu0  ;;  %v2333_v29 = vpop.f32.mrb[52].mxu1 }
0x1044   : > { %v2876_v31 = vmul.f32 -1.442695, %v2290_v28  ;;  %v2292_v33 = vpop.f32.mrb[37].mxu0  ;;  %v2335_v34 = vpop.f32.mrb[53].mxu1 }
0x1045   : > { %v2877_v35 = vmul.f32 -1.442695, %v2292_v33  ;;  %v2294_v36 = vpop.f32.mrb[38].mxu0  ;;  %v2337_v38 = vpop.f32.mrb[54].mxu1 }
0x1046   : > { %3378 = vpow2.f32 %v2876_v31  ;;  %v2878_v39 = vmul.f32 -1.442695, %v2294_v36  ;;  %v2296_v40 = vpop.f32.mrb[39].mxu0  ;;  %v2339_v44 = vpop.f32.mrb[55].mxu1 }
0x1047   : > { %3380 = vpow2.f32 %v2877_v35  ;;  %v2879_v43 = vmul.f32 -1.442695, %v2296_v40 }
0x1048   : > { %3382 = vpow2.f32 %v2878_v39 }
0x1049   : > { %3384 = vpow2.f32 %v2879_v43 }
0x1050   : > { %v3379_v46 = vpop.eup %3378 }
0x1051   : > { %v3381_v47 = vpop.eup %3380  ;;  %v2354_v48 = vadd.f32 1.0, %v3379_v46 }
0x1052   : > { %v3383_v50 = vpop.eup %3382  ;;  %v2355_v51 = vadd.f32 1.0, %v3381_v47 }
0x1053   : > { %v3385_v52 = vpop.eup %3384  ;;  %3386 = vrcp.f32 %v2354_v48  ;;  %v2356_v53 = vadd.f32 1.0, %v3383_v50 }
0x1054   : > { %3388 = vrcp.f32 %v2355_v51  ;;  %v2357_v54 = vadd.f32 1.0, %v3385_v52 }
0x1055   : > { %3390 = vrcp.f32 %v2356_v53 }
0x1056   : > { %3392 = vrcp.f32 %v2357_v54 }
0x105d   : > { %v3387_v56 = vpop.eup %3386 }
0x105e   : > { %v3389_v57 = vpop.eup %3388  ;;  %v2366_v58 = vmul.f32 %v3387_v56, %v2290_v28 }
0x105f   : > { %v3391_v42 = vpop.eup %3390  ;;  %v2367_v45 = vmul.f32 %v3389_v57, %v2292_v33 }
0x1060   : > { %v3393_v59 = vpop.eup %3392  ;;  %v2370_v60 = vmul.f32 %v2366_v58, %v2333_v29  ;;  %v2368_v61 = vmul.f32 %v3391_v42, %v2294_v36 }
0x1061   : > { %v2371_v62 = vmul.f32 %v2367_v45, %v2335_v34  ;;  %v2369_v49 = vmul.f32 %v3393_v59, %v2296_v40 }
0x1062   : > { %v2372_v63 = vmul.f32 %v2368_v61, %v2337_v38 }
0x1063   : > { %v2373_v0 = vmul.f32 %v2369_v49, %v2339_v44 }
0x1064   : > { %v2374_v2 = vpack.c.bf16 %v2372_v63, %v2370_v60 }
0x1065   : > { %v2375_v3 = vpack.c.bf16 %v2373_v0, %v2371_v62 }
0x1067   : > { %2536 = vmatprep.mubr.bf16.mxu0 %v2375_v3 }
0x1068   : > { %2537 = vmatmul.mubr.bf16.vlgmr.msra.gmra.mrb[40].mxu0 %v2374_v2 }
0x113b   : > { %v2974_v30 = vpop.f32.mrb[40].mxu0 }
0x113c   : > { %v2975_v10 = vpop.f32.mrb[41].mxu0 }
0x113d   : > { %v2976_v4 = vadd.f32 %v2975_v10, %v2974_v30  ;;  %v2977_v22 = vpop.f32.mrb[42].mxu0  ;;  %2552 = sbr.rel (%p2896_p3) target bundleno = 4590 (0x11ee), region = 96 }
0x113e   : > { %v2978_v5 = vpop.f32.mrb[43].mxu0 }
0x113f   : > { %v2545_v7 = vadd.f32 %v2976_v4, %v4405_v37  ;;  %v2979_v8 = vadd.f32 %v2978_v5, %v2977_v22 }
0x1141   : > { %2547 = vst [vmem:[#allocation2] sm:$0xff] %v2545_v7  ;;  %v2546_v55 = vadd.f32 %v2979_v8, %v4408_v41  ;;  %v2553_v6 = vmul.f32 (!%p2896_p3), %v2545_v7, %v2545_v7 }
0x1143   : > { %2548 = vst [vmem:[#allocation2 + $0x8] sm:$0xff] %v2546_v55  ;;  %v2554_v1 = vmul.f32 (!%p2896_p3), %v2546_v55, %v2546_v55  ;;  %v2561_v12 = vsel (!%p2896_p3), %vm2560_vm7, %v2553_v6, 0.0 }
0x1145   : > { %v2557_v9 = vrot.slane %v2554_v1, 7 }
0x1147   : > { %v2565_v11 = vsel %vm2564_vm6, %v2557_v9, 0.0 }
0x1148   : > { %2566 = vadd.xlane.f32.xlu0 %v2565_v11 }
0x114c   : > { %2562 = vadd.xlane.f32.xlu0 %v2561_v12 }
0x11d5   : > { %v2567_v13 = vpop.xlane.xlu0 %2566 }
0x11d6   : > { %v2569_v14 = vmul.f32 0.0078125, %v2567_v13 }
0x11d8   : > { %v2571_v37 = vadd.f32 1e-06, %v2569_v14 }
0x11d9   : > { %v2563_v15 = vpop.xlane.xlu0 %2562 }
0x11da   : > { %3396 = vrsqrt.f32 %v2571_v37  ;;  %v2568_v23 = vmul.f32 0.0078125, %v2563_v15 }
0x11dc   : > { %v2570_v41 = vadd.f32 1e-06, %v2568_v23 }
0x11de   : > { %3398 = vrsqrt.f32 %v2570_v41 }
0x11e4   : > { %v3397_v32 = vpop.eup %3396 }
0x11e5   : > { %v2576_v16 = vrot.slane %v3397_v32, 1 }
0x11e7   : > { %v2580_v18 = vmul.f32 %v2576_v16, %v2546_v55 }
0x11e8   : > { %v3399_v19 = vpop.eup %3398 }
0x11e9   : > { %v2589_v20 = vmul.f32 %v2897_v17, %v2580_v18  ;;  %v2579_v21 = vmul.f32 %v3399_v19, %v2545_v7 }
0x11eb   : > { %v2592_v24 = vrot.slane %v2589_v20, 7  ;;  %v2588_v25 = vmul.f32 %v2897_v17, %v2579_v21 }
0x11ed   : > { %2596 = vst [vmem:[#allocation15 + $0x1] sm:$0x1] %v2592_v24  ;;  %2595 = vst [vmem:[#allocation15 - $0x7] sm:$0x80] %v2588_v25 }
0x11ee PF: > { %p3181_p13 = scmp.eq.s32.totalorder %s3786_s17, 1  ;;  %s3711_s26 = smov [#allocation15]  }
0x11ef   : > { %s2604_s15 = sshll.u32 %s3711_s26, 4  ;;  %s2605_s15 = int_to_ptr.vmem [resolvable:$true] %s2604_s15 }
0x11f0   : > { %s3606_s3 = scalar_lea.vmem %s2605_s15, 32  ;;  %p3613_p0 = scmp.lt.s32.totalorder %s2605_s15, %s2605_s15 }
0x11f1   : > { %p3607_p1 = scmp.ne.s32.totalorder %s2605_s15, %s3606_s3  ;;  %p3614_p9 = scmp.lt.s32.totalorder %s3606_s3, %s3606_s3 }
0x11f3   : > { %p3608_p2 = pnand %p3607_p1, %p3181_p13  ;;  %p3615_p6 = por %p3614_p9, %p3613_p0 }
0x11f5   : > { %p3609_p4 = pneg %p3608_p2 }
0x11f7   : > { %p3616_p8 = pnand %p3615_p6, %p3609_p4 }
0x11f9   : > { %3619 = shalt.err (!%p3616_p8)
}
0x11fa   : > { %s4555_s23 = sld [smem:[#allocation28_spill]] }
0x1200   : > { %s3620_s11 = scalar_lea.hbm %s4555_s23, 32 }
0x1201   : > { %p3621_p11 = scmp.ne.s32.totalorder %s4555_s23, %s3620_s11  ;;  %p3626_p12 = scmp.lt.u32.totalorder %s3620_s11, %s4555_s23 }
0x1203   : > { %p3622_p7 = pnand %p3621_p11, %p3181_p13 }
0x1205   : > { %p3623_p5 = pneg %p3622_p7 }
0x1207   : > { %p3628_p10 = pnand %p3626_p12, %p3623_p5 }
0x1209   : > { %3631 = shalt.err (!%p3628_p10)
}
0x120a   : > { %3150 = dma.vmem_to_hbm [thread:$0]  (%p3181_p13), %s2605_s15, 32, %s4555_s23, [#allocation5]  }
0x120b   : > { %3669 = dma.done.wait (%p3181_p13), [#allocation5], 32  }
0x120c   : > { %3671 = vsyncadd (%p3181_p13), [#allocation5], 4294967264 }
0x120d PF: > { %s4556_s16 = sld [smem:[#allocation23_spill]]  ;;  %s4557_s21 = sld [smem:[#allocation22_spill]] }
0x120e   : > { %s4558_s15 = sld [smem:[#allocation24_spill]]  ;;  %s4559_s13 = smov %s3678_s14 }
0x1213   : > { %p28_p3 = scmp.ge.s32.totalorder %s4556_s16, 4   ;;  %s4560_s14 = smov %s4557_s21 }
0x1215   :  { %30 = sbr.rel (!%p28_p3) target bundleno = 14 (0xe), region = 165 }
0x121c   :  { %2617 = vsyncpa [#allocation4], 1 }
0x121d   :  { %2619 = vsyncpa [#allocation4 + $0x1], 1 }
0x121e   :  { %2620 = vsyncpa [#allocation7], 1 }
0x121f   :  { %2622 = vsyncpa [#allocation7 + $0x1], 1 }
0x1220   :  { %2623 = vsyncpa [#allocation10], 1 }
0x1221   :  { %2625 = vsyncpa [#allocation10 + $0x1], 1 }
0x1222   :  { %2626 = vsyncpa [#allocation13], 1 }
0x1223   :  { %2628 = vsyncpa [#allocation13 + $0x1], 1 }
0x1224   :  { %2629 = vsyncpa [#allocation5], 1 }
0x1225   :  { %2631 = vsyncpa [#allocation5 + $0x1], 1 }

</bundles_post_ra>
